<compile_context>
chip_gen: v7x
topology: tpu7x:2x2x1
jax: 0.10.0
libtpu: 0.0.40
codegen_flags: <defaults>
</compile_context>

<pallas_src>
import jax
import jax.numpy as jnp
from jax import lax
from jax.experimental import pallas as pl
from jax.experimental.pallas import tpu as pltpu


def _fused_residual_kernel(x_ref,
                           wqkv1_ref, bqkv1_ref, ww1_ref, bw1_ref,
                           wqkv2_ref, bqkv2_ref, ww2_ref, bw2_ref,
                           o_ref):
    """One grid step = one batch element, both non-local blocks fused.

    x_ref:    [1, C, HW]  (VMEM)          -- HW on the lane axis
    wqkv:     [3*Ci, C]   (theta/phi/g 1x1-conv weights, concatenated)
    bqkv:     [3*Ci, 1]
    ww:       [C, Ci]
    bw:       [C, 1]
    o_ref:    [1, C, HW]
    """
    x = x_ref[0].astype(jnp.float32)                          # [C, HW]

    def non_local(u, wqkv_ref, bqkv_ref, ww_ref, bw_ref):
        ci = wqkv_ref.shape[0] // 3

        # Merged theta/phi/g 1x1 convolutions: one [3Ci, C] @ [C, HW] push.
        tpg = jnp.dot(wqkv_ref[...], u,
                      preferred_element_type=jnp.float32) + bqkv_ref[...]
        theta = tpg[0 * ci:1 * ci]                            # [Ci, HW]
        phi   = tpg[1 * ci:2 * ci]                            # [Ci, HW]
        g     = tpg[2 * ci:3 * ci]                            # [Ci, HW]

        # f[k, q] = <phi[:, k], theta[:, q]>  -> [HW, HW]
        # keys on sublanes / queries on lanes so the softmax stats below are
        # lane-dense [1, HW] row vectors (no transpose for the final scale).
        f = lax.dot_general(phi.astype(jnp.bfloat16),
                            theta.astype(jnp.bfloat16),
                            dimension_numbers=(((0,), (0,)), ((), ())),
                            preferred_element_type=jnp.float32)

        # Unnormalized, max-stabilized softmax over keys (sublane axis).
        # Normalization is deferred past the PV matmul (exact reassociation).
        m = jnp.max(f, axis=0, keepdims=True)                 # [1, HW]
        p = jnp.exp(f - m)                                    # [HW, HW]
        denom = jnp.sum(p, axis=0, keepdims=True)             # [1, HW]

        # y_un[ci, q] = sum_k g[ci, k] * p[k, q]  -> [Ci, HW]; K = HW (MXU-sized)
        y_un = lax.dot_general(g.astype(jnp.bfloat16),
                               p.astype(jnp.bfloat16),
                               dimension_numbers=(((1,), (0,)), ((), ())),
                               preferred_element_type=jnp.float32)
        y = y_un * pl.reciprocal(denom, approx=True)          # scale is [1, HW]

        # W projection back to C channels + in-block residual.
        w_y = jnp.dot(ww_ref[...], y,
                      preferred_element_type=jnp.float32) + bw_ref[...]
        return w_y + u

    out1 = non_local(x, wqkv1_ref, bqkv1_ref, ww1_ref, bw1_ref)
    out1 = jnp.maximum(out1, 0.0)                             # layer1 act_fn (ReLU)

    out2 = non_local(out1, wqkv2_ref, bqkv2_ref, ww2_ref, bw2_ref)

    # Outer residual of Residual_Block_0, fused in-kernel.
    o_ref[0] = (out2 + x).astype(o_ref.dtype)


def _pack_qkv(p):
    """Concatenate theta/phi/g 1x1-conv weights/biases host-side."""
    wqkv = jnp.concatenate([p["w_theta"], p["w_phi"], p["w_g"]], axis=0)
    bqkv = jnp.concatenate([p["b_theta"], p["b_phi"], p["b_g"]], axis=0)
    return wqkv, bqkv, p["w_w"], p["b_w"]


def _fused_call(xf, p1, p2):
    """xf: [B, C, HW] float32.  p1/p2: weight dicts for the two NL blocks."""
    B, C, HW = xf.shape
    Ci = p1["w_theta"].shape[0]

    weight_args = (*_pack_qkv(p1), *_pack_qkv(p2))            # 8 tensors

    def full(shape):
        return pl.BlockSpec(shape, lambda b, _r=len(shape): (0,) * _r)

    in_specs = [pl.BlockSpec((1, C, HW), lambda b: (b, 0, 0))]
    in_specs += [full(a.shape) for a in weight_args]

    # Advisory cost estimate for XLA's scheduler (per block, per batch:
    # merged QKV dot + f dot + PV dot + W projection; exps = HW*HW).
    flops_per_block = (2 * (3 * Ci) * C * HW        # merged QKV 1x1 conv
                       + 2 * Ci * HW * HW           # f = phi^T theta
                       + 2 * Ci * HW * HW           # y = g @ p
                       + 2 * C * Ci * HW)           # W projection
    flops = 2 * B * flops_per_block
    transcendentals = 2 * B * HW * HW
    weight_bytes = sum(int(a.size) * a.dtype.itemsize for a in weight_args)
    bytes_accessed = 2 * int(xf.size) * xf.dtype.itemsize + weight_bytes

    return pl.pallas_call(
        _fused_residual_kernel,
        out_shape=jax.ShapeDtypeStruct((B, C, HW), xf.dtype),
        grid_spec=pltpu.PrefetchScalarGridSpec(
            num_scalar_prefetch=0,
            grid=(B,),
            in_specs=in_specs,
            out_specs=pl.BlockSpec((1, C, HW), lambda b: (b, 0, 0)),
        ),
        compiler_params=pltpu.CompilerParams(
            dimension_semantics=("parallel",)),   # megacore: batches across TCs
        cost_estimate=pl.CostEstimate(
            flops=flops,
            transcendentals=transcendentals,
            bytes_accessed=bytes_accessed),
    )(xf, *weight_args)


def residual_block_0(x_nchw, params1, params2):
    """Forward of Residual_Block_0.  x_nchw: [B, C, H, W] float32."""
    B, C, H, W = x_nchw.shape
    xf = x_nchw.reshape(B, C, H * W)              # NCHW -> [B, C, HW] (free reshape)
    out = _fused_call(xf, params1, params2)
    return out.reshape(B, C, H, W)


def make_non_local_params(key, in_dim, scale=0.1):
    """Deterministic 1x1-conv weights in PyTorch [out, in] layout."""
    inter = max(in_dim // 2, 1)
    ks = jax.random.split(key, 8)
    return {
        "w_theta": scale * jax.random.normal(ks[0], (inter, in_dim), jnp.float32),
        "w_phi":   scale * jax.random.normal(ks[1], (inter, in_dim), jnp.float32),
        "w_g":     scale * jax.random.normal(ks[2], (inter, in_dim), jnp.float32),
        "w_w":     scale * jax.random.normal(ks[3], (in_dim, inter), jnp.float32),
        "b_theta": scale * jax.random.normal(ks[4], (inter, 1), jnp.float32),
        "b_phi":   scale * jax.random.normal(ks[5], (inter, 1), jnp.float32),
        "b_g":     scale * jax.random.normal(ks[6], (inter, 1), jnp.float32),
        "b_w":     scale * jax.random.normal(ks[7], (in_dim, 1), jnp.float32),
    }


# ----------------------- pure-JAX reference ---------------------------------

def _non_local_ref(u, p, apply_relu):
    """u: [B, C, HW]."""
    theta = jnp.einsum("oc,bcs->bos", p["w_theta"], u) + p["b_theta"]
    phi   = jnp.einsum("oc,bcs->bos", p["w_phi"], u) + p["b_phi"]
    g     = jnp.einsum("oc,bcs->bos", p["w_g"], u) + p["b_g"]
    f = jnp.einsum("bcq,bck->bqk", theta, phi)
    attn = jax.nn.softmax(f, axis=-1)
    y = jnp.einsum("bqk,bck->bcq", attn, g)
    z = jnp.einsum("oc,bcs->bos", p["w_w"], y) + p["b_w"] + u
    return jnp.maximum(z, 0.0) if apply_relu else z


def _residual_block_ref(x_nchw, p1, p2):
    B, C, H, W = x_nchw.shape
    xf = x_nchw.reshape(B, C, H * W)
    out1 = _non_local_ref(xf, p1, True)
    out2 = _non_local_ref(out1, p2, False) + xf
    return out2.reshape(B, C, H, W)


if __name__ == "__main__":
    key = jax.random.PRNGKey(0)
    kx, k1, k2 = jax.random.split(key, 3)

    B, C, H, W = 2, 4, 16, 16                 # in_dim = 4, inter_channels = 2
    x = jax.random.normal(kx, (B, C, H, W), jnp.float32)

    params1 = make_non_local_params(k1, C)
    params2 = make_non_local_params(k2, C)

    out = jax.jit(residual_block_0)(x, params1, params2)
    out = jax.block_until_ready(out)

    ref = _residual_block_ref(x, params1, params2)
    assert out.shape == (B, C, H, W)
    err = float(jnp.max(jnp.abs(out - ref)))
    # bf16 MXU operands for the two [HW,HW]-scale dots + approx-reciprocal
    # softmax denominator: parity vs. the f32 reference is ~1e-3.
    assert err < 5e-3, f"mismatch vs pure-JAX reference: {err}"

    print("KERNEL_OK")
</pallas_src>

<mosaic_0001>
module attributes {stable_mosaic.version = 11 : i64} {
  func.func @_fused_residual_kernel(%arg0: i32, %arg1: memref<1x4x256xf32, #tpu.memory_space<vmem>>, %arg2: memref<6x4xf32, #tpu.memory_space<vmem>>, %arg3: memref<6x1xf32, #tpu.memory_space<vmem>>, %arg4: memref<4x2xf32, #tpu.memory_space<vmem>>, %arg5: memref<4x1xf32, #tpu.memory_space<vmem>>, %arg6: memref<6x4xf32, #tpu.memory_space<vmem>>, %arg7: memref<6x1xf32, #tpu.memory_space<vmem>>, %arg8: memref<4x2xf32, #tpu.memory_space<vmem>>, %arg9: memref<4x1xf32, #tpu.memory_space<vmem>>, %arg10: memref<1x4x256xf32, #tpu.memory_space<vmem>>) attributes {dimension_semantics = [#tpu.dimension_semantics<parallel>], iteration_bounds = array<i64: 2>, scalar_prefetch = 0 : i64, scratch_operands = 0 : i64, tpu.core_type = #tpu.core_type<tc>, window_params = [{transform_indices = @transform_0, window_bounds = array<i64: 1, 4, 256>}, {pipeline_mode = #tpu.pipeline_mode<synchronous>, transform_indices = @transform_1, window_bounds = array<i64: 6, 4>}, {pipeline_mode = #tpu.pipeline_mode<synchronous>, transform_indices = @transform_2, window_bounds = array<i64: 6, 1>}, {pipeline_mode = #tpu.pipeline_mode<synchronous>, transform_indices = @transform_3, window_bounds = array<i64: 4, 2>}, {pipeline_mode = #tpu.pipeline_mode<synchronous>, transform_indices = @transform_4, window_bounds = array<i64: 4, 1>}, {pipeline_mode = #tpu.pipeline_mode<synchronous>, transform_indices = @transform_5, window_bounds = array<i64: 6, 4>}, {pipeline_mode = #tpu.pipeline_mode<synchronous>, transform_indices = @transform_6, window_bounds = array<i64: 6, 1>}, {pipeline_mode = #tpu.pipeline_mode<synchronous>, transform_indices = @transform_7, window_bounds = array<i64: 4, 2>}, {pipeline_mode = #tpu.pipeline_mode<synchronous>, transform_indices = @transform_8, window_bounds = array<i64: 4, 1>}, {transform_indices = @transform_9, window_bounds = array<i64: 1, 4, 256>}]} {
    %c0 = arith.constant 0 : index
    %c0_0 = arith.constant 0 : index
    %c0_1 = arith.constant 0 : index
    %0 = vector.load %arg1[%c0, %c0_0, %c0_1] : memref<1x4x256xf32, #tpu.memory_space<vmem>>, vector<1x4x256xf32>
    %1 = vector.shape_cast %0 : vector<1x4x256xf32> to vector<4x256xf32>
    %c0_2 = arith.constant 0 : index
    %c0_3 = arith.constant 0 : index
    %2 = vector.load %arg2[%c0_2, %c0_3] : memref<6x4xf32, #tpu.memory_space<vmem>>, vector<6x4xf32>
    %cst = arith.constant dense<0.000000e+00> : vector<6x256xf32>
    %3 = tpu.matmul %2, %1, %cst {dimension_numbers = #tpu.dot_dimension_numbers<[1], [0], [0], [1], [0, 0, 1, 1], [], []>} : vector<6x4xf32>, vector<4x256xf32>, vector<6x256xf32> -> vector<6x256xf32>
    %c0_4 = arith.constant 0 : index
    %c0_5 = arith.constant 0 : index
    %4 = vector.load %arg3[%c0_4, %c0_5] : memref<6x1xf32, #tpu.memory_space<vmem>>, vector<6x1xf32>
    %5 = vector.broadcast %4 : vector<6x1xf32> to vector<6x256xf32>
    %6 = arith.addf %3, %5 : vector<6x256xf32>
    %7 = vector.extract_strided_slice %6 {offsets = [0, 0], sizes = [2, 256], strides = [1, 1]} : vector<6x256xf32> to vector<2x256xf32>
    %8 = vector.extract_strided_slice %6 {offsets = [2, 0], sizes = [2, 256], strides = [1, 1]} : vector<6x256xf32> to vector<2x256xf32>
    %9 = vector.extract_strided_slice %6 {offsets = [4, 0], sizes = [2, 256], strides = [1, 1]} : vector<6x256xf32> to vector<2x256xf32>
    %10 = arith.truncf %8 : vector<2x256xf32> to vector<2x256xbf16>
    %11 = arith.truncf %7 : vector<2x256xf32> to vector<2x256xbf16>
    %cst_6 = arith.constant dense<0.000000e+00> : vector<256x256xf32>
    %12 = tpu.matmul %10, %11, %cst_6 {dimension_numbers = #tpu.dot_dimension_numbers<[0], [0], [1], [1], [0, 1, 1, 1], [], []>} : vector<2x256xbf16>, vector<2x256xbf16>, vector<256x256xf32> -> vector<256x256xf32>
    %cst_7 = arith.constant dense<0xFF800000> : vector<256xf32>
    %13 = vector.multi_reduction <maximumf>, %12, %cst_7 [0] : vector<256x256xf32> to vector<256xf32>
    %14 = vector.shape_cast %13 : vector<256xf32> to vector<1x256xf32>
    %15 = vector.broadcast %14 : vector<1x256xf32> to vector<256x256xf32>
    %16 = arith.subf %12, %15 : vector<256x256xf32>
    %17 = math.exp %16 : vector<256x256xf32>
    %cst_8 = arith.constant dense<0.000000e+00> : vector<256xf32>
    %18 = vector.multi_reduction <add>, %17, %cst_8 [0] : vector<256x256xf32> to vector<256xf32>
    %19 = vector.shape_cast %18 : vector<256xf32> to vector<1x256xf32>
    %20 = arith.truncf %9 : vector<2x256xf32> to vector<2x256xbf16>
    %21 = arith.truncf %17 : vector<256x256xf32> to vector<256x256xbf16>
    %cst_9 = arith.constant dense<0.000000e+00> : vector<2x256xf32>
    %22 = tpu.matmul %20, %21, %cst_9 {dimension_numbers = #tpu.dot_dimension_numbers<[1], [0], [0], [1], [0, 0, 1, 1], [], []>} : vector<2x256xbf16>, vector<256x256xbf16>, vector<2x256xf32> -> vector<2x256xf32>
    %23 = tpu.reciprocal %19 {approx = true} : vector<1x256xf32> -> vector<1x256xf32>
    %24 = vector.broadcast %23 : vector<1x256xf32> to vector<2x256xf32>
    %25 = arith.mulf %22, %24 : vector<2x256xf32>
    %c0_10 = arith.constant 0 : index
    %c0_11 = arith.constant 0 : index
    %26 = vector.load %arg4[%c0_10, %c0_11] : memref<4x2xf32, #tpu.memory_space<vmem>>, vector<4x2xf32>
    %cst_12 = arith.constant dense<0.000000e+00> : vector<4x256xf32>
    %27 = tpu.matmul %26, %25, %cst_12 {dimension_numbers = #tpu.dot_dimension_numbers<[1], [0], [0], [1], [0, 0, 1, 1], [], []>} : vector<4x2xf32>, vector<2x256xf32>, vector<4x256xf32> -> vector<4x256xf32>
    %c0_13 = arith.constant 0 : index
    %c0_14 = arith.constant 0 : index
    %28 = vector.load %arg5[%c0_13, %c0_14] : memref<4x1xf32, #tpu.memory_space<vmem>>, vector<4x1xf32>
    %29 = vector.broadcast %28 : vector<4x1xf32> to vector<4x256xf32>
    %30 = arith.addf %27, %29 : vector<4x256xf32>
    %31 = arith.addf %30, %1 : vector<4x256xf32>
    %cst_15 = arith.constant 0.000000e+00 : f32
    %32 = vector.broadcast %cst_15 : f32 to vector<4x256xf32>
    %33 = arith.maximumf %31, %32 : vector<4x256xf32>
    %c0_16 = arith.constant 0 : index
    %c0_17 = arith.constant 0 : index
    %34 = vector.load %arg6[%c0_16, %c0_17] : memref<6x4xf32, #tpu.memory_space<vmem>>, vector<6x4xf32>
    %cst_18 = arith.constant dense<0.000000e+00> : vector<6x256xf32>
    %35 = tpu.matmul %34, %33, %cst_18 {dimension_numbers = #tpu.dot_dimension_numbers<[1], [0], [0], [1], [0, 0, 1, 1], [], []>} : vector<6x4xf32>, vector<4x256xf32>, vector<6x256xf32> -> vector<6x256xf32>
    %c0_19 = arith.constant 0 : index
    %c0_20 = arith.constant 0 : index
    %36 = vector.load %arg7[%c0_19, %c0_20] : memref<6x1xf32, #tpu.memory_space<vmem>>, vector<6x1xf32>
    %37 = vector.broadcast %36 : vector<6x1xf32> to vector<6x256xf32>
    %38 = arith.addf %35, %37 : vector<6x256xf32>
    %39 = vector.extract_strided_slice %38 {offsets = [0, 0], sizes = [2, 256], strides = [1, 1]} : vector<6x256xf32> to vector<2x256xf32>
    %40 = vector.extract_strided_slice %38 {offsets = [2, 0], sizes = [2, 256], strides = [1, 1]} : vector<6x256xf32> to vector<2x256xf32>
    %41 = vector.extract_strided_slice %38 {offsets = [4, 0], sizes = [2, 256], strides = [1, 1]} : vector<6x256xf32> to vector<2x256xf32>
    %42 = arith.truncf %40 : vector<2x256xf32> to vector<2x256xbf16>
    %43 = arith.truncf %39 : vector<2x256xf32> to vector<2x256xbf16>
    %cst_21 = arith.constant dense<0.000000e+00> : vector<256x256xf32>
    %44 = tpu.matmul %42, %43, %cst_21 {dimension_numbers = #tpu.dot_dimension_numbers<[0], [0], [1], [1], [0, 1, 1, 1], [], []>} : vector<2x256xbf16>, vector<2x256xbf16>, vector<256x256xf32> -> vector<256x256xf32>
    %cst_22 = arith.constant dense<0xFF800000> : vector<256xf32>
    %45 = vector.multi_reduction <maximumf>, %44, %cst_22 [0] : vector<256x256xf32> to vector<256xf32>
    %46 = vector.shape_cast %45 : vector<256xf32> to vector<1x256xf32>
    %47 = vector.broadcast %46 : vector<1x256xf32> to vector<256x256xf32>
    %48 = arith.subf %44, %47 : vector<256x256xf32>
    %49 = math.exp %48 : vector<256x256xf32>
    %cst_23 = arith.constant dense<0.000000e+00> : vector<256xf32>
    %50 = vector.multi_reduction <add>, %49, %cst_23 [0] : vector<256x256xf32> to vector<256xf32>
    %51 = vector.shape_cast %50 : vector<256xf32> to vector<1x256xf32>
    %52 = arith.truncf %41 : vector<2x256xf32> to vector<2x256xbf16>
    %53 = arith.truncf %49 : vector<256x256xf32> to vector<256x256xbf16>
    %cst_24 = arith.constant dense<0.000000e+00> : vector<2x256xf32>
    %54 = tpu.matmul %52, %53, %cst_24 {dimension_numbers = #tpu.dot_dimension_numbers<[1], [0], [0], [1], [0, 0, 1, 1], [], []>} : vector<2x256xbf16>, vector<256x256xbf16>, vector<2x256xf32> -> vector<2x256xf32>
    %55 = tpu.reciprocal %51 {approx = true} : vector<1x256xf32> -> vector<1x256xf32>
    %56 = vector.broadcast %55 : vector<1x256xf32> to vector<2x256xf32>
    %57 = arith.mulf %54, %56 : vector<2x256xf32>
    %c0_25 = arith.constant 0 : index
    %c0_26 = arith.constant 0 : index
    %58 = vector.load %arg8[%c0_25, %c0_26] : memref<4x2xf32, #tpu.memory_space<vmem>>, vector<4x2xf32>
    %cst_27 = arith.constant dense<0.000000e+00> : vector<4x256xf32>
    %59 = tpu.matmul %58, %57, %cst_27 {dimension_numbers = #tpu.dot_dimension_numbers<[1], [0], [0], [1], [0, 0, 1, 1], [], []>} : vector<4x2xf32>, vector<2x256xf32>, vector<4x256xf32> -> vector<4x256xf32>
    %c0_28 = arith.constant 0 : index
    %c0_29 = arith.constant 0 : index
    %60 = vector.load %arg9[%c0_28, %c0_29] : memref<4x1xf32, #tpu.memory_space<vmem>>, vector<4x1xf32>
    %61 = vector.broadcast %60 : vector<4x1xf32> to vector<4x256xf32>
    %62 = arith.addf %59, %61 : vector<4x256xf32>
    %63 = arith.addf %62, %33 : vector<4x256xf32>
    %64 = arith.addf %63, %1 : vector<4x256xf32>
    %c0_30 = arith.constant 0 : index
    %c0_31 = arith.constant 0 : index
    %c0_32 = arith.constant 0 : index
    %65 = vector.load %arg10[%c0_30, %c0_31, %c0_32] : memref<1x4x256xf32, #tpu.memory_space<vmem>>, vector<1x4x256xf32>
    %66 = vector.shape_cast %65 : vector<1x4x256xf32> to vector<4x256xf32>
    %67 = vector.shape_cast %64 : vector<4x256xf32> to vector<1x4x256xf32>
    tpu.vector_store %arg10[%c0_30, %c0_31, %c0_32], %67 {strides = array<i32>} : memref<1x4x256xf32, #tpu.memory_space<vmem>>, vector<1x4x256xf32>,
    return
  }
  func.func @transform_0(%arg0: i32) -> (i32, i32, i32) {
    %c0_i32 = arith.constant 0 : i32
    %c0_i32_0 = arith.constant 0 : i32
    %c0_i32_1 = arith.constant 0 : i32
    return %arg0, %c0_i32, %c0_i32_0 : i32, i32, i32
  }
  func.func @transform_1(%arg0: i32) -> (i32, i32) {
    %c0_i32 = arith.constant 0 : i32
    %c0_i32_0 = arith.constant 0 : i32
    %c0_i32_1 = arith.constant 0 : i32
    return %c0_i32, %c0_i32_0 : i32, i32
  }
  func.func @transform_2(%arg0: i32) -> (i32, i32) {
    %c0_i32 = arith.constant 0 : i32
    %c0_i32_0 = arith.constant 0 : i32
    %c0_i32_1 = arith.constant 0 : i32
    return %c0_i32, %c0_i32_0 : i32, i32
  }
  func.func @transform_3(%arg0: i32) -> (i32, i32) {
    %c0_i32 = arith.constant 0 : i32
    %c0_i32_0 = arith.constant 0 : i32
    %c0_i32_1 = arith.constant 0 : i32
    return %c0_i32, %c0_i32_0 : i32, i32
  }
  func.func @transform_4(%arg0: i32) -> (i32, i32) {
    %c0_i32 = arith.constant 0 : i32
    %c0_i32_0 = arith.constant 0 : i32
    %c0_i32_1 = arith.constant 0 : i32
    return %c0_i32, %c0_i32_0 : i32, i32
  }
  func.func @transform_5(%arg0: i32) -> (i32, i32) {
    %c0_i32 = arith.constant 0 : i32
    %c0_i32_0 = arith.constant 0 : i32
    %c0_i32_1 = arith.constant 0 : i32
    return %c0_i32, %c0_i32_0 : i32, i32
  }
  func.func @transform_6(%arg0: i32) -> (i32, i32) {
    %c0_i32 = arith.constant 0 : i32
    %c0_i32_0 = arith.constant 0 : i32
    %c0_i32_1 = arith.constant 0 : i32
    return %c0_i32, %c0_i32_0 : i32, i32
  }
  func.func @transform_7(%arg0: i32) -> (i32, i32) {
    %c0_i32 = arith.constant 0 : i32
    %c0_i32_0 = arith.constant 0 : i32
    %c0_i32_1 = arith.constant 0 : i32
    return %c0_i32, %c0_i32_0 : i32, i32
  }
  func.func @transform_8(%arg0: i32) -> (i32, i32) {
    %c0_i32 = arith.constant 0 : i32
    %c0_i32_0 = arith.constant 0 : i32
    %c0_i32_1 = arith.constant 0 : i32
    return %c0_i32, %c0_i32_0 : i32, i32
  }
  func.func @transform_9(%arg0: i32) -> (i32, i32, i32) {
    %c0_i32 = arith.constant 0 : i32
    %c0_i32_0 = arith.constant 0 : i32
    %c0_i32_1 = arith.constant 0 : i32
    return %arg0, %c0_i32, %c0_i32_0 : i32, i32, i32
  }
}

</mosaic_0001>

<bundles_post_ra>
// kernel: residual_block_0.1
= control target key start
LH: loop header
LB: loop body
LE: loop exit
PB: predicated region body
PF: predicated region fallthrough
CT: control target
= control target key end

     0   :  { %s2571_s30 = smov 0   ;;  %s3997_s0 = inlined_call_operand.vmem [shape: f32[2,4,256], index: 0, kind: input, shape index: {}]   ;;  %s3998_s1 = inlined_call_operand.vmem [shape: f32[6,4], index: 1, kind: input, shape index: {}]   ;;  %s3999_s2 = inlined_call_operand.vmem [shape: f32[6,1], index: 2, kind: input, shape index: {}]   ;;  %s4000_s3 = inlined_call_operand.vmem [shape: f32[4,2], index: 3, kind: input, shape index: {}]   ;;  %s4001_s4 = inlined_call_operand.vmem [shape: f32[4,1], index: 4, kind: input, shape index: {}]   ;;  %s4002_s5 = inlined_call_operand.vmem [shape: f32[6,4], index: 5, kind: input, shape index: {}]   ;;  %s4003_s6 = inlined_call_operand.vmem [shape: f32[6,1], index: 6, kind: input, shape index: {}]   ;;  %s4004_s7 = inlined_call_operand.vmem [shape: f32[4,2], index: 7, kind: input, shape index: {}]   ;;  %s4005_s8 = inlined_call_operand.vmem [shape: f32[4,1], index: 8, kind: input, shape index: {}]   ;;  %s4006_s9 = inlined_call_operand.vmem [shape: f32[2,4,256], index: 9, kind: output, shape index: {}]  }
   0x1 LB: > { %s2173_s10 = sadd.s32 4294967295, %s2517_s30   ;;  %p2177_p0 = scmp.ge.s32.totalorder %s2517_s30, 1  ;;  %s2517_s30 = sphi %s2571_s30, %s19_s30  }
   0x2   : > { %p287_p1 = scmp.lt.s32.totalorder %s2517_s30, 3 }
   0x4   : > { %p288_p2 = pnand %p2177_p0, %p287_p1 }
   0x6   : > { %291 = sbr.rel (%p288_p2) target bundleno = 2484 (0x9b4), region = 56 }
   0xd   : > { %p323_p3 = scmp.lt.s32.totalorder %s2173_s10, 1  ;;  %v4009_v0 = vmov 0.0   ;;  %v336_v1 = vld [vmem:[%s3999_s2] sm:$0x3f]  ;;  %v4007_v2 = vmov 0   ;;  %vm348_vm0 = vcmask 1043456  }
   0xe   : > { %417 = vmatprep.mubr.f32.mxu1 %v4009_v0  ;;  %2242 = vset.pattern.permute.xlu0 %v4007_v2  ;;  %v335_v5 = vld [vmem:[%s3998_s1] sm:$0x3f]  ;;  %vm344_vm1 = vcmask 31744   ;;  %vm513_vm2 = vcmask 1040384   ;;  %vm464_vm3 = vcmask 15360   ;;  %vm1144_vm4 = vcmask 1041408  }
   0xf   : > { %s4325_s10 = smov (!%p323_p3, %s2173_s10), 1  ;;  %339 = vperm.xlu0 %2242, %v336_v1   ;;  %v1228_v17 = vld [vmem:[%s4003_s6] sm:$0x3f] }
  0x10   : > { %s2230_s13 = sshll.u32 %s4325_s10, 3 }
  0x11   : > { %s2592_s16 = scalar_lea.vmem %s3997_s0, %s2230_s13  ;;  %s332_s15 = scalar_lea.vmem %s4006_s9, %s2230_s13 }
  0x12   : > { %v334_v3 = vld [vmem:[%s2592_s16] sm:$0xff] }
  0x13   : > { %v2595_v4 = vcombine.high %v334_v3, %v334_v3 }
  0x15   : > { %4104 = vst [vmem:[#allocation2_spill] sm:$0xff] %v2595_v4  ;;  %2182 = vmatprep.subr.msk.mxu1 %vm348_vm0, %v2595_v4 }
  0x16   : > { %2183 = vmatpush1.msk.msra.mxu1 %vm348_vm0, %v334_v3 }
  0x17   : > { %2184 = vmatmul.mubr.msk.f32.vlgmr.msra.gmra.mrb[0].mxu1 %vm344_vm1, %v335_v5 }
  0x18   : > { %552 = vmatprep.mubr.bf16.mxu1 %v4007_v2 }
  0x8e   : > { %v340_v6 = vpop.permute.xlu0 %339 }
  0xea   : > { %v419_v7 = vpop.f32.mrb[0].mxu1 }
  0xeb   : > { %v420_v8 = vadd.f32 %v419_v7, %v340_v6  ;;  %v421_v9 = vpop.f32.mrb[1].mxu1 }
  0xec   : > { %v422_v10 = vadd.f32 %v421_v9, %v340_v6 }
  0xed   : > { %v2605_v11 = vpack.c.bf16 %v420_v8, %v420_v8 }
  0xee   : > { %v425_v12 = vpack.c.bf16 %v422_v10, %v422_v10 }
  0xef   : > { %4105 = vst [vmem:[#allocation3_spill] sm:$0xff] %v2605_v11  ;;  %v515_v13 = vsel %vm513_vm2, %v2605_v11, 0  ;;  %v428_v14 = vrot.slane %v2605_v11, 1 }
  0xf0   : > { %2185 = vmatprep.subr.msk.bf16.mxu1 %vm513_vm2, %v425_v12  ;;  %v1086_v15 = vrot.slane %v425_v12, 2  ;;  %v429_v16 = vrot.slane %v425_v12, 1 }
  0xf1   : > { %521 = vmatpush1.bf16.msra.mxu1 %v515_v13  ;;  %432 = vxpose.xlu0.c.b16.start.end [1/1] (short) %v428_v14, 128 }
  0xf2   : > { %1121 = vmatprep.mubr.bf16.mxu0 %v1086_v15  ;;  %448 = vxpose.xlu1.c.b16.start.end [1/1] (short) %v429_v16, 128 }
  0xf6   : > { %2243 = vset.pattern.permute.xlu1 %v4007_v2 }
 0x116   : > { %1231 = vperm.xlu0 %2242, %v1228_v17  }
 0x157   : > { %v440_v18 = vpop.trf.xlu0 }
 0x158   : > { %2186 = vmatmul.mubr.msk.bf16.vlgmr.msra.gmra.mrb[4].mxu1 %vm464_vm3, %v440_v18  ;;  %v456_v26 = vpop.trf.xlu1 }
 0x159   : > { %562 = vmatprep.mubr.bf16.mxu1 %v4007_v2 }
 0x15b   : > { %v441_v19 = vpop.trf.xlu0 }
 0x15c   : > { %v457_v27 = vpop.trf.xlu1 }
 0x15f   : > { %v442_v20 = vpop.trf.xlu0 }
 0x160   : > { %2187 = vmatmul.mubr.msk.bf16.gmra.mrb[8].mxu1 %vm464_vm3, %v441_v19  ;;  %v458_v28 = vpop.trf.xlu1 }
 0x161   : > { %572 = vmatprep.mubr.bf16.mxu1 %v4007_v2 }
 0x163   : > { %v443_v21 = vpop.trf.xlu0 }
 0x164   : > { %v459_v29 = vpop.trf.xlu1 }
 0x167   : > { %v444_v22 = vpop.trf.xlu0 }
 0x168   : > { %2188 = vmatmul.mubr.msk.bf16.gmra.mrb[12].mxu1 %vm464_vm3, %v442_v20  ;;  %v460_v30 = vpop.trf.xlu1 }
 0x169   : > { %582 = vmatprep.mubr.bf16.mxu1 %v4007_v2 }
 0x16b   : > { %v445_v23 = vpop.trf.xlu0 }
 0x16c   : > { %v461_v31 = vpop.trf.xlu1 }
 0x16f   : > { %v446_v24 = vpop.trf.xlu0 }
 0x170   : > { %2189 = vmatmul.mubr.msk.bf16.gmra.mrb[16].mxu1 %vm464_vm3, %v443_v21  ;;  %v462_v32 = vpop.trf.xlu1 }
 0x171   : > { %592 = vmatprep.mubr.bf16.mxu1 %v4007_v2 }
 0x173   : > { %v447_v25 = vpop.trf.xlu0 }
 0x174   : > { %v463_v33 = vpop.trf.xlu1 }
 0x178   : > { %2190 = vmatmul.mubr.msk.bf16.gmra.mrb[20].mxu1 %vm464_vm3, %v444_v22 }
 0x179   : > { %602 = vmatprep.mubr.bf16.mxu1 %v4007_v2 }
 0x180   : > { %2191 = vmatmul.mubr.msk.bf16.gmra.mrb[24].mxu1 %vm464_vm3, %v445_v23 }
 0x181   : > { %612 = vmatprep.mubr.bf16.mxu1 %v4007_v2 }
 0x188   : > { %2192 = vmatmul.mubr.msk.bf16.gmra.mrb[28].mxu1 %vm464_vm3, %v446_v24 }
 0x189   : > { %622 = vmatprep.mubr.bf16.mxu1 %v4007_v2 }
 0x190   : > { %2193 = vmatmul.mubr.msk.bf16.gmra.mrb[32].mxu1 %vm464_vm3, %v447_v25 }
 0x191   : > { %632 = vmatprep.mubr.bf16.mxu1 %v4007_v2 }
 0x198   : > { %2194 = vmatmul.mubr.msk.bf16.gmra.mrb[36].mxu1 %vm464_vm3, %v456_v26 }
 0x199   : > { %642 = vmatprep.mubr.bf16.mxu1 %v4007_v2 }
 0x1a0   : > { %2195 = vmatmul.mubr.msk.bf16.gmra.mrb[40].mxu1 %vm464_vm3, %v457_v27 }
 0x1a1   : > { %652 = vmatprep.mubr.bf16.mxu1 %v4007_v2 }
 0x1a8   : > { %2196 = vmatmul.mubr.msk.bf16.gmra.mrb[44].mxu1 %vm464_vm3, %v458_v28 }
 0x1a9   : > { %662 = vmatprep.mubr.bf16.mxu1 %v4007_v2 }
 0x1b0   : > { %2197 = vmatmul.mubr.msk.bf16.gmra.mrb[48].mxu1 %vm464_vm3, %v459_v29 }
 0x1b1   : > { %672 = vmatprep.mubr.bf16.mxu1 %v4007_v2 }
 0x1b8   : > { %2198 = vmatmul.mubr.msk.bf16.gmra.mrb[52].mxu1 %vm464_vm3, %v460_v30 }
 0x1b9   : > { %682 = vmatprep.mubr.bf16.mxu1 %v4007_v2 }
 0x1c0   : > { %2199 = vmatmul.mubr.msk.bf16.gmra.mrb[56].mxu1 %vm464_vm3, %v461_v31 }
 0x1c1   : > { %692 = vmatprep.mubr.bf16.mxu1 %v4007_v2 }
 0x1c8   : > { %2200 = vmatmul.mubr.msk.bf16.gmra.mrb[60].mxu1 %vm464_vm3, %v462_v32 }
 0x1c9   : > { %702 = vmatprep.mubr.bf16.mxu1 %v4007_v2 }
 0x1d0   : > { %2201 = vmatmul.mubr.msk.bf16.gmra.mrb[64].mxu1 %vm464_vm3, %v463_v33 }
 0x22b   : > { %v2646_v34 = vpop.f32.mrb[4].mxu1 }
 0x22c   : > { %v2648_v35 = vpop.f32.mrb[5].mxu1 }
 0x22d   : > { %v2650_v36 = vpop.f32.mrb[6].mxu1 }
 0x22e   : > { %v2652_v37 = vpop.f32.mrb[7].mxu1 }
 0x233   : > { %v2654_v38 = vpop.f32.mrb[8].mxu1 }
 0x234   : > { %v713_v39 = vmax.f32 %v2646_v34, %v2654_v38  ;;  %v2658_v40 = vpop.f32.mrb[9].mxu1 }
 0x235   : > { %v750_v41 = vmax.f32 %v2648_v35, %v2658_v40  ;;  %v2662_v42 = vpop.f32.mrb[10].mxu1 }
 0x236   : > { %v714_v43 = vmax.f32 %v2650_v36, %v2662_v42  ;;  %v2666_v44 = vpop.f32.mrb[11].mxu1 }
 0x237   : > { %v751_v45 = vmax.f32 %v2652_v37, %v2666_v44 }
 0x23b   : > { %v2670_v46 = vpop.f32.mrb[12].mxu1 }
 0x23c   : > { %v715_v47 = vmax.f32 %v713_v39, %v2670_v46  ;;  %v2673_v48 = vpop.f32.mrb[13].mxu1 }
 0x23d   : > { %v752_v49 = vmax.f32 %v750_v41, %v2673_v48  ;;  %v2676_v50 = vpop.f32.mrb[14].mxu1 }
 0x23e   : > { %v716_v51 = vmax.f32 %v714_v43, %v2676_v50  ;;  %v2679_v52 = vpop.f32.mrb[15].mxu1 }
 0x23f   : > { %v753_v53 = vmax.f32 %v751_v45, %v2679_v52 }
 0x243   : > { %v2682_v54 = vpop.f32.mrb[16].mxu1 }
 0x244   : > { %v717_v55 = vmax.f32 %v715_v47, %v2682_v54  ;;  %v2685_v56 = vpop.f32.mrb[17].mxu1 }
 0x245   : > { %v754_v57 = vmax.f32 %v752_v49, %v2685_v56  ;;  %v2688_v58 = vpop.f32.mrb[18].mxu1 }
 0x246   : > { %v718_v59 = vmax.f32 %v716_v51, %v2688_v58  ;;  %v2691_v60 = vpop.f32.mrb[19].mxu1 }
 0x247   : > { %v755_v61 = vmax.f32 %v753_v53, %v2691_v60 }
 0x24b   : > { %v2694_v62 = vpop.f32.mrb[20].mxu1 }
 0x24c   : > { %v719_v63 = vmax.f32 %v717_v55, %v2694_v62  ;;  %v2697_v1 = vpop.f32.mrb[21].mxu1 }
 0x24d   : > { %v756_v3 = vmax.f32 %v754_v57, %v2697_v1  ;;  %v2700_v5 = vpop.f32.mrb[22].mxu1 }
 0x24e   : > { %v720_v6 = vmax.f32 %v718_v59, %v2700_v5  ;;  %v2703_v7 = vpop.f32.mrb[23].mxu1 }
 0x24f   : > { %v757_v8 = vmax.f32 %v755_v61, %v2703_v7 }
 0x253   : > { %v2706_v9 = vpop.f32.mrb[24].mxu1 }
 0x254   : > { %v721_v10 = vmax.f32 %v719_v63, %v2706_v9  ;;  %v2709_v12 = vpop.f32.mrb[25].mxu1 }
 0x255   : > { %v758_v13 = vmax.f32 %v756_v3, %v2709_v12  ;;  %v2712_v14 = vpop.f32.mrb[26].mxu1 }
 0x256   : > { %v722_v15 = vmax.f32 %v720_v6, %v2712_v14  ;;  %v2715_v16 = vpop.f32.mrb[27].mxu1 }
 0x257   : > { %4106 = vst [vmem:[#allocation4_spill] sm:$0xff] %v2715_v16  ;;  %v759_v17 = vmax.f32 %v757_v8, %v2715_v16 }
 0x25b   : > { %v2718_v18 = vpop.f32.mrb[28].mxu1 }
 0x25c   : > { %v723_v19 = vmax.f32 %v721_v10, %v2718_v18  ;;  %v2721_v20 = vpop.f32.mrb[29].mxu1 }
 0x25d   : > { %4107 = vst [vmem:[#allocation5_spill] sm:$0xff] %v2721_v20  ;;  %v760_v21 = vmax.f32 %v758_v13, %v2721_v20  ;;  %v2724_v22 = vpop.f32.mrb[30].mxu1 }
 0x25e   : > { %v724_v23 = vmax.f32 %v722_v15, %v2724_v22  ;;  %v2727_v24 = vpop.f32.mrb[31].mxu1 }
 0x25f   : > { %4108 = vst [vmem:[#allocation6_spill] sm:$0xff] %v2727_v24  ;;  %v761_v25 = vmax.f32 %v759_v17, %v2727_v24 }
 0x263   : > { %v2730_v26 = vpop.f32.mrb[32].mxu1 }
 0x264   : > { %v725_v27 = vmax.f32 %v723_v19, %v2730_v26  ;;  %v2733_v28 = vpop.f32.mrb[33].mxu1 }
 0x265   : > { %4109 = vst [vmem:[#allocation7_spill] sm:$0xff] %v2733_v28  ;;  %v762_v29 = vmax.f32 %v760_v21, %v2733_v28  ;;  %v2736_v30 = vpop.f32.mrb[34].mxu1 }
 0x266   : > { %v726_v31 = vmax.f32 %v724_v23, %v2736_v30  ;;  %v2739_v32 = vpop.f32.mrb[35].mxu1 }
 0x267   : > { %4110 = vst [vmem:[#allocation8_spill] sm:$0xff] %v2739_v32  ;;  %v763_v33 = vmax.f32 %v761_v25, %v2739_v32 }
 0x26b   : > { %v2742_v39 = vpop.f32.mrb[36].mxu1 }
 0x26c   : > { %v727_v41 = vmax.f32 %v725_v27, %v2742_v39  ;;  %v2745_v43 = vpop.f32.mrb[37].mxu1 }
 0x26d   : > { %4111 = vst [vmem:[#allocation9_spill] sm:$0xff] %v2745_v43  ;;  %v764_v45 = vmax.f32 %v762_v29, %v2745_v43  ;;  %v2748_v47 = vpop.f32.mrb[38].mxu1 }
 0x26e   : > { %v728_v49 = vmax.f32 %v726_v31, %v2748_v47  ;;  %v2751_v51 = vpop.f32.mrb[39].mxu1 }
 0x26f   : > { %4112 = vst [vmem:[#allocation10_spill] sm:$0xff] %v2751_v51  ;;  %v765_v53 = vmax.f32 %v763_v33, %v2751_v51 }
 0x273   : > { %v2754_v55 = vpop.f32.mrb[40].mxu1 }
 0x274   : > { %v729_v57 = vmax.f32 %v727_v41, %v2754_v55  ;;  %v2757_v59 = vpop.f32.mrb[41].mxu1 }
 0x275   : > { %4113 = vst [vmem:[#allocation11_spill] sm:$0xff] %v2757_v59  ;;  %v766_v61 = vmax.f32 %v764_v45, %v2757_v59  ;;  %v2760_v63 = vpop.f32.mrb[42].mxu1 }
 0x276   : > { %v730_v3 = vmax.f32 %v728_v49, %v2760_v63  ;;  %v2763_v6 = vpop.f32.mrb[43].mxu1 }
 0x277   : > { %4114 = vst [vmem:[#allocation12_spill] sm:$0xff] %v2763_v6  ;;  %v767_v8 = vmax.f32 %v765_v53, %v2763_v6 }
 0x27b   : > { %v2766_v10 = vpop.f32.mrb[44].mxu1 }
 0x27c   : > { %v731_v13 = vmax.f32 %v729_v57, %v2766_v10  ;;  %v2769_v15 = vpop.f32.mrb[45].mxu1 }
 0x27d   : > { %4115 = vst [vmem:[#allocation13_spill] sm:$0xff] %v2769_v15  ;;  %v768_v17 = vmax.f32 %v766_v61, %v2769_v15  ;;  %v2772_v19 = vpop.f32.mrb[46].mxu1 }
 0x27e   : > { %v732_v21 = vmax.f32 %v730_v3, %v2772_v19  ;;  %v2775_v23 = vpop.f32.mrb[47].mxu1 }
 0x27f   : > { %4116 = vst [vmem:[#allocation14_spill] sm:$0xff] %v2775_v23  ;;  %v769_v25 = vmax.f32 %v767_v8, %v2775_v23 }
 0x283   : > { %v2778_v27 = vpop.f32.mrb[48].mxu1 }
 0x284   : > { %v733_v29 = vmax.f32 %v731_v13, %v2778_v27  ;;  %v2781_v31 = vpop.f32.mrb[49].mxu1 }
 0x285   : > { %4117 = vst [vmem:[#allocation15_spill] sm:$0xff] %v2781_v31  ;;  %v770_v33 = vmax.f32 %v768_v17, %v2781_v31  ;;  %v2784_v41 = vpop.f32.mrb[50].mxu1 }
 0x286   : > { %v734_v45 = vmax.f32 %v732_v21, %v2784_v41  ;;  %v2787_v49 = vpop.f32.mrb[51].mxu1 }
 0x287   : > { %4118 = vst [vmem:[#allocation16_spill] sm:$0xff] %v2787_v49  ;;  %v771_v53 = vmax.f32 %v769_v25, %v2787_v49 }
 0x28b   : > { %v2790_v57 = vpop.f32.mrb[52].mxu1 }
 0x28c   : > { %v735_v61 = vmax.f32 %v733_v29, %v2790_v57  ;;  %v2793_v3 = vpop.f32.mrb[53].mxu1 }
 0x28d   : > { %4119 = vst [vmem:[#allocation17_spill] sm:$0xff] %v2793_v3  ;;  %v772_v8 = vmax.f32 %v770_v33, %v2793_v3  ;;  %v2796_v13 = vpop.f32.mrb[54].mxu1 }
 0x28e   : > { %v736_v17 = vmax.f32 %v734_v45, %v2796_v13  ;;  %v2799_v2 = vpop.f32.mrb[55].mxu1 }
 0x28f   : > { %4120 = vst [vmem:[#allocation18_spill] sm:$0xff] %v2799_v2  ;;  %v773_v21 = vmax.f32 %v771_v53, %v2799_v2 }
 0x293   : > { %v2802_v0 = vpop.f32.mrb[56].mxu1 }
 0x294   : > { %v737_v25 = vmax.f32 %v735_v61, %v2802_v0  ;;  %v2805_v4 = vpop.f32.mrb[57].mxu1 }
 0x295   : > { %4121 = vst [vmem:[#allocation19_spill] sm:$0xff] %v2805_v4  ;;  %v774_v29 = vmax.f32 %v772_v8, %v2805_v4  ;;  %v2808_v11 = vpop.f32.mrb[58].mxu1 }
 0x296   : > { %v738_v33 = vmax.f32 %v736_v17, %v2808_v11  ;;  %v2811_v3 = vpop.f32.mrb[59].mxu1 }
 0x297   : > { %4122 = vst [vmem:[#allocation20_spill] sm:$0xff] %v2811_v3  ;;  %v775_v45 = vmax.f32 %v773_v21, %v2811_v3 }
 0x29b   : > { %v2814_v49 = vpop.f32.mrb[60].mxu1 }
 0x29c   : > { %v739_v53 = vmax.f32 %v737_v25, %v2814_v49  ;;  %v2817_v2 = vpop.f32.mrb[61].mxu1 }
 0x29d   : > { %4123 = vst [vmem:[#allocation21_spill] sm:$0xff] %v2817_v2  ;;  %v776_v61 = vmax.f32 %v774_v29, %v2817_v2  ;;  %v2820_v31 = vpop.f32.mrb[62].mxu1 }
 0x29e   : > { %v740_v8 = vmax.f32 %v738_v33, %v2820_v31  ;;  %v2823_v4 = vpop.f32.mrb[63].mxu1 }
 0x29f   : > { %4124 = vst [vmem:[#allocation22_spill] sm:$0xff] %v2823_v4  ;;  %v777_v17 = vmax.f32 %v775_v45, %v2823_v4 }
 0x2a3   : > { %v2826_v23 = vpop.f32.mrb[64].mxu1 }
 0x2a4   : > { %v741_v21 = vmax.f32 %v739_v53, %v2826_v23  ;;  %v2829_v3 = vpop.f32.mrb[65].mxu1 }
 0x2a5   : > { %4125 = vst [vmem:[#allocation23_spill] sm:$0xff] %v2829_v3  ;;  %v778_v25 = vmax.f32 %v776_v61, %v2829_v3  ;;  %v2832_v15 = vpop.f32.mrb[66].mxu1 }
 0x2a6   : > { %v742_v29 = vmax.f32 %v740_v8, %v2832_v15  ;;  %v2835_v2 = vpop.f32.mrb[67].mxu1 }
 0x2a7   : > { %4126 = vst [vmem:[#allocation24_spill] sm:$0xff] %v2835_v2  ;;  %v779_v33 = vmax.f32 %v777_v17, %v2835_v2 }
 0x2a8   : > { %v743_v6 = vmax.f32 %v741_v21, %v742_v29 }
 0x2a9   : > { %v780_v59 = vmax.f32 %v778_v25, %v779_v33 }
 0x2aa   : > { %v744_v51 = vrot.slane %v743_v6, 4 }
 0x2ab   : > { %v781_v45 = vrot.slane %v780_v59, 4 }
 0x2ac   : > { %v745_v4 = vmax.f32 %v743_v6, %v744_v51 }
 0x2ad   : > { %v782_v43 = vmax.f32 %v780_v59, %v781_v45 }
 0x2ae   : > { %v746_v32 = vrot.slane %v745_v4, 2 }
 0x2af   : > { %v783_v53 = vrot.slane %v782_v43, 2 }
 0x2b0   : > { %v747_v28 = vmax.f32 %v745_v4, %v746_v32  ;;  %v4146_v32 = vld [vmem:[#allocation23_spill] sm:$0xff] }
 0x2b1   : > { %v784_v24 = vmax.f32 %v782_v43, %v783_v53 }
 0x2b2   : > { %v748_v20 = vrot.slane %v747_v28, 1 }
 0x2b3   : > { %v785_v61 = vrot.slane %v784_v24, 1 }
 0x2b4   : > { %v2838_v3 = vmax.f32 %v747_v28, %v748_v20 }
 0x2b5   : > { %v2840_v16 = vmax.f32 %v784_v24, %v785_v61 }
 0x2b6   : > { %v787_v8 = vsub.f32 %v2646_v34, %v2838_v3  ;;  %v789_v17 = vsub.f32 %v2650_v36, %v2838_v3  ;;  %v791_v51 = vsub.f32 %v2654_v38, %v2838_v3  ;;  %v793_v59 = vsub.f32 %v2662_v42, %v2838_v3 }
 0x2b7   : > { %v795_v4 = vsub.f32 %v2670_v46, %v2838_v3  ;;  %v797_v20 = vsub.f32 %v2676_v50, %v2838_v3  ;;  %v799_v24 = vsub.f32 %v2682_v54, %v2838_v3  ;;  %v801_v34 = vsub.f32 %v2688_v58, %v2838_v3 }
 0x2b8   : > { %v803_v36 = vsub.f32 %v2694_v62, %v2838_v3  ;;  %v805_v38 = vsub.f32 %v2700_v5, %v2838_v3  ;;  %v807_v42 = vsub.f32 %v2706_v9, %v2838_v3  ;;  %v809_v46 = vsub.f32 %v2712_v14, %v2838_v3 }
 0x2b9   : > { %v811_v50 = vsub.f32 %v2718_v18, %v2838_v3  ;;  %v813_v54 = vsub.f32 %v2724_v22, %v2838_v3  ;;  %v815_v58 = vsub.f32 %v2730_v26, %v2838_v3  ;;  %v817_v62 = vsub.f32 %v2736_v30, %v2838_v3 }
 0x2ba   : > { %v819_v5 = vsub.f32 %v2742_v39, %v2838_v3  ;;  %v821_v9 = vsub.f32 %v2748_v47, %v2838_v3  ;;  %v823_v14 = vsub.f32 %v2754_v55, %v2838_v3  ;;  %v825_v18 = vsub.f32 %v2760_v63, %v2838_v3 }
 0x2bb   : > { %v827_v22 = vsub.f32 %v2766_v10, %v2838_v3  ;;  %v829_v26 = vsub.f32 %v2772_v19, %v2838_v3  ;;  %v831_v28 = vsub.f32 %v2778_v27, %v2838_v3  ;;  %v833_v30 = vsub.f32 %v2784_v41, %v2838_v3 }
 0x2bc   : > { %v851_v19 = vmul.f32 1.442695, %v787_v8  ;;  %v855_v27 = vmul.f32 1.442695, %v789_v17  ;;  %v859_v41 = vmul.f32 1.442695, %v791_v51 }
 0x2bd   : > { %v863_v25 = vmul.f32 1.442695, %v793_v59  ;;  %v867_v33 = vmul.f32 1.442695, %v795_v4  ;;  %v871_v45 = vmul.f32 1.442695, %v797_v20 }
 0x2be   : > { %2245 = vpow2.f32 %v851_v19  ;;  %v875_v53 = vmul.f32 1.442695, %v799_v24  ;;  %v879_v61 = vmul.f32 1.442695, %v801_v34  ;;  %v883_v6 = vmul.f32 1.442695, %v803_v36 }
 0x2bf   : > { %2247 = vpow2.f32 %v855_v27  ;;  %v887_v10 = vmul.f32 1.442695, %v805_v38  ;;  %v891_v8 = vmul.f32 1.442695, %v807_v42  ;;  %v895_v17 = vmul.f32 1.442695, %v809_v46 }
 0x2c0   : > { %2249 = vpow2.f32 %v859_v41  ;;  %v899_v51 = vmul.f32 1.442695, %v811_v50  ;;  %v903_v21 = vmul.f32 1.442695, %v813_v54  ;;  %v907_v59 = vmul.f32 1.442695, %v815_v58 }
 0x2c1   : > { %2251 = vpow2.f32 %v863_v25  ;;  %v911_v63 = vmul.f32 1.442695, %v817_v62  ;;  %v915_v29 = vmul.f32 1.442695, %v819_v5  ;;  %v919_v19 = vmul.f32 1.442695, %v821_v9 }
 0x2c2   : > { %2253 = vpow2.f32 %v867_v33  ;;  %v923_v4 = vmul.f32 1.442695, %v823_v14  ;;  %v927_v20 = vmul.f32 1.442695, %v825_v18  ;;  %v931_v27 = vmul.f32 1.442695, %v827_v22 }
 0x2c3   : > { %2255 = vpow2.f32 %v871_v45  ;;  %v2910_v24 = vmul.f32 1.442695, %v829_v26  ;;  %v2912_v34 = vmul.f32 1.442695, %v831_v28  ;;  %v2914_v36 = vmul.f32 1.442695, %v833_v30 }
 0x2c4   : > { %2257 = vpow2.f32 %v875_v53  ;;  %v4127_v22 = vld [vmem:[#allocation4_spill] sm:$0xff]  ;;  %v4129_v41 = vld [vmem:[#allocation6_spill] sm:$0xff]  ;;  %v4130_v45 = vld [vmem:[#allocation7_spill] sm:$0xff] }
 0x2c5   : > { %2259 = vpow2.f32 %v879_v61  ;;  %v4131_v61 = vld [vmem:[#allocation8_spill] sm:$0xff]  ;;  %v4133_v18 = vld [vmem:[#allocation10_spill] sm:$0xff]  ;;  %v4134_v14 = vld [vmem:[#allocation11_spill] sm:$0xff] }
 0x2c6   : > { %2261 = vpow2.f32 %v883_v6  ;;  %v4128_v6 = vld [vmem:[#allocation5_spill] sm:$0xff]  ;;  %v4135_v53 = vld [vmem:[#allocation12_spill] sm:$0xff]  ;;  %v4137_v58 = vld [vmem:[#allocation14_spill] sm:$0xff] }
 0x2c7   : > { %2263 = vpow2.f32 %v887_v10  ;;  %v4136_v62 = vld [vmem:[#allocation13_spill] sm:$0xff]  ;;  %v4138_v25 = vld [vmem:[#allocation15_spill] sm:$0xff]  ;;  %v4139_v46 = vld [vmem:[#allocation16_spill] sm:$0xff] }
 0x2c8   : > { %v2924_v54 = vpop.eup %2245  ;;  %2265 = vpow2.f32 %v891_v8  ;;  %v4140_v8 = vld [vmem:[#allocation17_spill] sm:$0xff]  ;;  %v4141_v38 = vld [vmem:[#allocation18_spill] sm:$0xff] }
 0x2c9   : > { %v2932_v9 = vpop.eup %2247  ;;  %2267 = vpow2.f32 %v895_v17  ;;  %v4132_v17 = vld [vmem:[#allocation9_spill] sm:$0xff] }
 0x2ca   : > { %v2940_v28 = vpop.eup %2249  ;;  %2269 = vpow2.f32 %v899_v51  ;;  %v979_v30 = vadd.f32 %v2932_v9, %v2924_v54  ;;  %v4145_v51 = vld [vmem:[#allocation22_spill] sm:$0xff] }
 0x2cb   : > { %v2948_v33 = vpop.eup %2251  ;;  %2271 = vpow2.f32 %v903_v21  ;;  %v4143_v21 = vld [vmem:[#allocation20_spill] sm:$0xff] }
 0x2cc   : > { %v2956_v26 = vpop.eup %2253  ;;  %2273 = vpow2.f32 %v907_v59  ;;  %v980_v10 = vadd.f32 %v2940_v28, %v979_v30 }
 0x2cd   : > { %v2963_v5 = vpop.eup %2255  ;;  %2275 = vpow2.f32 %v911_v63 }
 0x2ce   : > { %v2971_v50 = vpop.eup %2257  ;;  %2277 = vpow2.f32 %v915_v29  ;;  %v981_v30 = vadd.f32 %v2948_v33, %v980_v10 }
 0x2cf   : > { %v2978_v42 = vpop.eup %2259  ;;  %2279 = vpow2.f32 %v919_v19 }
 0x2d0   : > { %v2986_v47 = vpop.eup %2261  ;;  %2281 = vpow2.f32 %v923_v4  ;;  %v982_v10 = vadd.f32 %v2956_v26, %v981_v30  ;;  %v4147_v30 = vsub.f32 %v2790_v57, %v2838_v3 }
 0x2d1   : > { %v2993_v39 = vpop.eup %2263  ;;  %2283 = vpow2.f32 %v927_v20  ;;  %v4148_v20 = vsub.f32 %v2796_v13, %v2838_v3 }
 0x2d2   : > { %v3001_v55 = vpop.eup %2265  ;;  %2285 = vpow2.f32 %v931_v27  ;;  %v947_v63 = vmul.f32 1.442695, %v4147_v30  ;;  %v983_v19 = vadd.f32 %v2963_v5, %v982_v10  ;;  %v4149_v27 = vsub.f32 %v2802_v0, %v2838_v3 }
 0x2d3   : > { %v3007_v43 = vpop.eup %2267  ;;  %2287 = vpow2.f32 %v2910_v24  ;;  %v951_v29 = vmul.f32 1.442695, %v4148_v20  ;;  %v4150_v24 = vsub.f32 %v2808_v11, %v2838_v3  ;;  %v4154_v11 = vsub.f32 %v2826_v23, %v2838_v3 }
 0x2d4   : > { %v3013_v59 = vpop.eup %2269  ;;  %2289 = vpow2.f32 %v2912_v34  ;;  %v955_v4 = vmul.f32 1.442695, %v4149_v27  ;;  %v984_v57 = vadd.f32 %v2971_v50, %v983_v19  ;;  %v4151_v34 = vsub.f32 %v2814_v49, %v2838_v3 }
 0x2d5   : > { %v3020_v30 = vpop.eup %2271  ;;  %2291 = vpow2.f32 %v2914_v36  ;;  %v959_v10 = vmul.f32 1.442695, %v4150_v24  ;;  %v4152_v19 = vsub.f32 %v2820_v31, %v2838_v3 }
 0x2d6   : > { %v3026_v13 = vpop.eup %2273  ;;  %2293 = vpow2.f32 %v947_v63  ;;  %v963_v20 = vmul.f32 1.442695, %v4151_v34  ;;  %v985_v0 = vadd.f32 %v2978_v42, %v984_v57  ;;  %v971_v63 = vmul.f32 1.442695, %v4154_v11 }
 0x2d7   : > { %v3032_v27 = vpop.eup %2275  ;;  %2295 = vpow2.f32 %v951_v29  ;;  %v967_v36 = vmul.f32 1.442695, %v4152_v19  ;;  %v4155_v57 = vsub.f32 %v2832_v15, %v2838_v3  ;;  %v4158_v15 = vsub.f32 %v2658_v40, %v2840_v16 }
 0x2d8   : > { %v3037_v2 = vpop.eup %2277  ;;  %2297 = vpow2.f32 %v955_v4  ;;  %v986_v24 = vadd.f32 %v2986_v47, %v985_v0  ;;  %v4156_v4 = vsub.f32 %v2648_v35, %v2840_v16  ;;  %v4157_v0 = vsub.f32 %v2652_v37, %v2840_v16 }
 0x2d9   : > { %4153 = vst [vmem:[#allocation4_spill] sm:$0xff] %v3037_v2  ;;  %v3043_v49 = vpop.eup %2279  ;;  %2299 = vpow2.f32 %v959_v10  ;;  %v975_v29 = vmul.f32 1.442695, %v4155_v57  ;;  %v861_v3 = vmul.f32 1.442695, %v4158_v15  ;;  %v4159_v35 = vsub.f32 %v2666_v44, %v2840_v16 }
 0x2da   : > { %v3048_v34 = vpop.eup %2281  ;;  %2301 = vpow2.f32 %v963_v20  ;;  %v987_v31 = vadd.f32 %v2993_v39, %v986_v24  ;;  %v853_v19 = vmul.f32 1.442695, %v4156_v4  ;;  %v857_v10 = vmul.f32 1.442695, %v4157_v0 }
 0x2db   : > { %v3054_v23 = vpop.eup %2283  ;;  %2303 = vpow2.f32 %v967_v36  ;;  %v865_v24 = vmul.f32 1.442695, %v4159_v35  ;;  %v4160_v36 = vsub.f32 %v2673_v48, %v2840_v16  ;;  %v4161_v37 = vsub.f32 %v2679_v52, %v2840_v16 }
 0x2dc   : > { %v3062_v11 = vpop.eup %2285  ;;  %2305 = vpow2.f32 %v971_v63  ;;  %v988_v20 = vadd.f32 %v3001_v55, %v987_v31  ;;  %v4162_v63 = vsub.f32 %v2685_v56, %v2840_v16  ;;  %v4163_v31 = vsub.f32 %v2691_v60, %v2840_v16 }
 0x2dd   : > { %v869_v57 = vmul.f32 1.442695, %v4160_v36  ;;  %v3071_v4 = vpop.eup %2287  ;;  %2307 = vpow2.f32 %v975_v29  ;;  %v873_v40 = vmul.f32 1.442695, %v4161_v37  ;;  %v4164_v29 = vsub.f32 %v2697_v1, %v2840_v16 }
 0x2de   : > { %v877_v0 = vmul.f32 1.442695, %v4162_v63  ;;  %v881_v44 = vmul.f32 1.442695, %v4163_v31  ;;  %v3082_v15 = vpop.eup %2289  ;;  %v989_v48 = vadd.f32 %v3007_v43, %v988_v20  ;;  %2309 = vpow2.f32 %v853_v19 }
 0x2df   : > { %v885_v35 = vmul.f32 1.442695, %v4164_v29  ;;  %v4165_v52 = vsub.f32 %v2703_v7, %v2840_v16  ;;  %v3091_v37 = vpop.eup %2291  ;;  %2311 = vpow2.f32 %v857_v10 }
 0x2e0   : > { %v3099_v20 = vpop.eup %2293  ;;  %v990_v1 = vadd.f32 %v3013_v59, %v989_v48  ;;  %2313 = vpow2.f32 %v861_v3 }
 0x2e1   : > { %v889_v36 = vmul.f32 1.442695, %v4165_v52  ;;  %v3106_v63 = vpop.eup %2295  ;;  %2315 = vpow2.f32 %v865_v24  ;;  %v4166_v24 = vsub.f32 %v2709_v12, %v2840_v16  ;;  %v4167_v52 = vsub.f32 %v4127_v22, %v2840_v16 }
 0x2e2   : > { %v3114_v48 = vpop.eup %2297  ;;  %v991_v3 = vadd.f32 %v3020_v30, %v990_v1  ;;  %2317 = vpow2.f32 %v869_v57 }
 0x2e3   : > { %v3121_v7 = vpop.eup %2299  ;;  %2319 = vpow2.f32 %v873_v40  ;;  %v893_v10 = vmul.f32 1.442695, %v4166_v24  ;;  %v897_v29 = vmul.f32 1.442695, %v4167_v52 }
 0x2e4   : > { %v3129_v1 = vpop.eup %2301  ;;  %v992_v57 = vadd.f32 %v3026_v13, %v991_v3  ;;  %2321 = vpow2.f32 %v877_v0  ;;  %v4168_v0 = vsub.f32 %v4128_v6, %v2840_v16  ;;  %v4173_v6 = vsub.f32 %v4133_v18, %v2840_v16 }
 0x2e5   : > { %v3137_v19 = vpop.eup %2303  ;;  %2323 = vpow2.f32 %v881_v44  ;;  %v4169_v44 = vsub.f32 %v4129_v41, %v2840_v16  ;;  %v4172_v41 = vsub.f32 %v4132_v17, %v2840_v16  ;;  %v4176_v18 = vsub.f32 %v4136_v62, %v2840_v16 }
 0x2e6   : > { %v3142_v31 = vpop.eup %2305  ;;  %v993_v60 = vadd.f32 %v3032_v27, %v992_v57  ;;  %2325 = vpow2.f32 %v885_v35  ;;  %v901_v12 = vmul.f32 1.442695, %v4168_v0  ;;  %v4170_v35 = vsub.f32 %v4130_v45, %v2840_v16 }
 0x2e7   : > { %v3150_v24 = vpop.eup %2307  ;;  %2327 = vpow2.f32 %v889_v36  ;;  %v905_v22 = vmul.f32 1.442695, %v4169_v44  ;;  %v4171_v36 = vsub.f32 %v4131_v61, %v2840_v16  ;;  %v917_v44 = vmul.f32 1.442695, %v4172_v41 }
 0x2e8   : > { %v2310_v52 = vpop.eup %2309  ;;  %v994_v40 = vadd.f32 %v3037_v2, %v993_v60  ;;  %2329 = vpow2.f32 %v893_v10  ;;  %v909_v57 = vmul.f32 1.442695, %v4170_v35  ;;  %v4174_v61 = vsub.f32 %v4134_v14, %v2840_v16 }
 0x2e9   : > { %v2312_v0 = vpop.eup %2311  ;;  %2331 = vpow2.f32 %v897_v29  ;;  %v913_v3 = vmul.f32 1.442695, %v4171_v36  ;;  %v921_v29 = vmul.f32 1.442695, %v4173_v6  ;;  %v933_v6 = vmul.f32 1.442695, %v4176_v18 }
 0x2ea   : > { %v2314_v56 = vpop.eup %2313  ;;  %v995_v60 = vadd.f32 %v3043_v49, %v994_v40  ;;  %2333 = vpow2.f32 %v901_v12  ;;  %v1016_v10 = vadd.f32 %v2312_v0, %v2310_v52  ;;  %v1054_v45 = vpack.c.bf16 %v2312_v0, %v2310_v52 }
 0x2eb   : > { %v2316_v35 = vpop.eup %2315  ;;  %2335 = vpow2.f32 %v905_v22  ;;  %v925_v36 = vmul.f32 1.442695, %v4174_v61  ;;  %v4175_v22 = vsub.f32 %v4135_v53, %v2840_v16  ;;  %v4177_v14 = vpack.c.bf16 %v2932_v9, %v2924_v54 }
 0x2ec   : > { %v2318_v2 = vpop.eup %2317  ;;  %v996_v17 = vadd.f32 %v3048_v34, %v995_v60  ;;  %2337 = vpow2.f32 %v909_v57  ;;  %v1017_v41 = vadd.f32 %v2314_v56, %v1016_v10  ;;  %1089 = vmatprep.subr.bf16.mxu0 %v1054_v45  ;;  %v1056_v40 = vpack.c.bf16 %v2316_v35, %v2314_v56 }
 0x2ed   : > { %v2320_v12 = vpop.eup %2319  ;;  %2339 = vpow2.f32 %v913_v3  ;;  %v929_v52 = vmul.f32 1.442695, %v4175_v22  ;;  %1090 = vmatpush1.bf16.msra.mxu0 %v4177_v14  ;;  %v4178_v53 = vsub.f32 %v4137_v58, %v2840_v16  ;;  %v4179_v62 = vsub.f32 %v4138_v25, %v2840_v16  ;;  %v4184_v14 = vld [vmem:[#allocation19_spill] sm:$0xff] }
 0x2ee   : > { %v2322_v0 = vpop.eup %2321  ;;  %v997_v57 = vadd.f32 %v3054_v23, %v996_v17  ;;  %2341 = vpow2.f32 %v917_v44  ;;  %v1018_v60 = vadd.f32 %v2316_v35, %v1017_v41  ;;  %1091 = vmatprep.subr.bf16.mxu0 %v1056_v40  ;;  %v1058_v56 = vpack.c.bf16 %v2320_v12, %v2318_v2 }
 0x2ef   : > { %v2324_v3 = vpop.eup %2323  ;;  %2343 = vpow2.f32 %v921_v29  ;;  %v937_v10 = vmul.f32 1.442695, %v4178_v53  ;;  %v941_v45 = vmul.f32 1.442695, %v4179_v62  ;;  %v4180_v35 = vsub.f32 %v4139_v46, %v2840_v16 }
 0x2f0   : > { %v2326_v61 = vpop.eup %2325  ;;  %v998_v54 = vadd.f32 %v3062_v11, %v997_v57  ;;  %2345 = vpow2.f32 %v925_v36  ;;  %v1019_v9 = vadd.f32 %v2318_v2, %v1018_v60  ;;  %v1060_v17 = vpack.c.bf16 %v2324_v3, %v2322_v0 }
 0x2f1   : > { %v2328_v44 = vpop.eup %2327  ;;  %2347 = vpow2.f32 %v929_v52  ;;  %v945_v29 = vmul.f32 1.442695, %v4180_v35  ;;  %v4181_v58 = vsub.f32 %v4140_v8, %v2840_v16  ;;  %v4182_v25 = vpack.c.bf16 %v2948_v33, %v2940_v28 }
 0x2f2   : > { %v2330_v40 = vpop.eup %2329  ;;  %v999_v22 = vadd.f32 %v3071_v4, %v998_v54  ;;  %2349 = vpow2.f32 %v933_v6  ;;  %v1020_v2 = vadd.f32 %v2320_v12, %v1019_v9  ;;  %v1062_v36 = vpack.c.bf16 %v2328_v44, %v2326_v61 }
 0x2f3   : > { %v949_v41 = vmul.f32 1.442695, %v4181_v58  ;;  %1092 = vmatpush1.bf16.msra.mxu0 %v4182_v25  ;;  %v2332_v52 = vpop.eup %2331  ;;  %2351 = vpow2.f32 %v937_v10  ;;  %v4183_v46 = vsub.f32 %v4141_v38, %v2840_v16  ;;  %v4185_v8 = vsub.f32 %v4184_v14, %v2840_v16  ;;  %v4187_v10 = vld [vmem:[#allocation21_spill] sm:$0xff] }
 0x2f4   : > { %1093 = vmatprep.subr.bf16.mxu0 %v1058_v56  ;;  %v2334_v60 = vpop.eup %2333  ;;  %v1000_v28 = vadd.f32 %v3082_v15, %v999_v22  ;;  %2353 = vpow2.f32 %v941_v45  ;;  %v1021_v33 = vadd.f32 %v2322_v0, %v1020_v2  ;;  %v1064_v53 = vpack.c.bf16 %v2332_v52, %v2330_v40 }
 0x2f5   : > { %v953_v18 = vmul.f32 1.442695, %v4183_v46  ;;  %v957_v57 = vmul.f32 1.442695, %v4185_v8  ;;  %v2336_v6 = vpop.eup %2335  ;;  %2355 = vpow2.f32 %v945_v29  ;;  %v4186_v12 = vsub.f32 %v4143_v21, %v2840_v16 }
 0x2f6   : > { %v4188_v38 = vsub.f32 %v4187_v10, %v2840_v16  ;;  %v4189_v54 = vpack.c.bf16 %v2963_v5, %v2956_v26  ;;  %v2338_v9 = vpop.eup %2337  ;;  %v1001_v35 = vadd.f32 %v3091_v37, %v1000_v28  ;;  %2357 = vpow2.f32 %v949_v41 }
 0x2f7   : > { %v961_v56 = vmul.f32 1.442695, %v4186_v12  ;;  %v1022_v0 = vadd.f32 %v2324_v3, %v1021_v33  ;;  %v1066_v45 = vpack.c.bf16 %v2336_v6, %v2334_v60  ;;  %v2340_v29 = vpop.eup %2339  ;;  %2359 = vpow2.f32 %v953_v18  ;;  %v4192_v3 = vld [vmem:[#allocation24_spill] sm:$0xff] }
 0x2f8   : > { %v965_v62 = vmul.f32 1.442695, %v4188_v38  ;;  %1094 = vmatpush1.bf16.msra.mxu0 %v4189_v54  ;;  %v4190_v21 = vsub.f32 %v4145_v51, %v2840_v16  ;;  %v4191_v25 = vsub.f32 %v4146_v32, %v2840_v16  ;;  %v2342_v2 = vpop.eup %2341  ;;  %v1002_v5 = vadd.f32 %v3099_v20, %v1001_v35 }
 0x2f9   : > { %1095 = vmatprep.subr.bf16.mxu0 %v1060_v17  ;;  %2361 = vpow2.f32 %v957_v57  ;;  %v1023_v26 = vadd.f32 %v2326_v61, %v1022_v0  ;;  %v1068_v46 = vpack.c.bf16 %v2340_v29, %v2338_v9  ;;  %v2344_v41 = vpop.eup %2343  ;;  %v4193_v17 = vsub.f32 %v4192_v3, %v2840_v16 }
 0x2fa   : > { %v969_v58 = vmul.f32 1.442695, %v4190_v21  ;;  %v973_v22 = vmul.f32 1.442695, %v4191_v25  ;;  %2363 = vpow2.f32 %v961_v56  ;;  %v4194_v51 = vpack.c.bf16 %v2978_v42, %v2971_v50  ;;  %v2346_v14 = vpop.eup %2345 }
 0x2fb   : > { %v977_v18 = vmul.f32 1.442695, %v4193_v17  ;;  %v1003_v32 = vadd.f32 %v3106_v63, %v1002_v5  ;;  %2365 = vpow2.f32 %v965_v62  ;;  %v1024_v8 = vadd.f32 %v2328_v44, %v1023_v26  ;;  %v2348_v57 = vpop.eup %2347 }
 0x2fc   : > { %1096 = vmatpush1.bf16.msra.mxu0 %v4194_v51  ;;  %v1070_v28 = vpack.c.bf16 %v2344_v41, %v2342_v2  ;;  %2367 = vpow2.f32 %v969_v58  ;;  %v2350_v61 = vpop.eup %2349  ;;  %v1072_v16 = vpack.c.bf16 %v2348_v57, %v2346_v14  ;;  %v4195_v42 = vpack.c.bf16 %v2993_v39, %v2986_v47 }
 0x2fd   : > { %1097 = vmatprep.subr.bf16.mxu0 %v1062_v36  ;;  %v1004_v33 = vadd.f32 %v3114_v48, %v1003_v32  ;;  %2369 = vpow2.f32 %v973_v22  ;;  %v1025_v12 = vadd.f32 %v2330_v40, %v1024_v8  ;;  %v2352_v56 = vpop.eup %2351  ;;  %v4196_v21 = vpack.c.bf16 %v3007_v43, %v3001_v55 }
 0x2fe   : > { %2371 = vpow2.f32 %v977_v18  ;;  %v2354_v50 = vpop.eup %2353  ;;  %v1074_v36 = vpack.c.bf16 %v2352_v56, %v2350_v61  ;;  %v4198_v32 = vpack.c.bf16 %v3032_v27, %v3026_v13  ;;  %v4202_v13 = vpack.c.bf16 %v3071_v4, %v3062_v11 }
 0x2ff   : > { %v1005_v10 = vadd.f32 %v3121_v7, %v1004_v33  ;;  %v1026_v44 = vadd.f32 %v2332_v52, %v1025_v12  ;;  %v2356_v38 = vpop.eup %2355  ;;  %v4199_v33 = vld [vmem:[#allocation4_spill] sm:$0xff]  ;;  %v4205_v11 = vpack.c.bf16 %v3121_v7, %v3114_v48  ;;  %v1135_v7 = vld [vmem:[%s4001_s4] sm:$0xf] }
 0x300   : > { %1098 = vmatpush1.bf16.msra.mxu0 %v4195_v42  ;;  %v2358_v62 = vpop.eup %2357  ;;  %v1076_v0 = vpack.c.bf16 %v2356_v38, %v2354_v50  ;;  %1138 = vperm.xlu1 %2243, %v1135_v7  }
 0x301   : > { %1099 = vmatprep.subr.bf16.mxu0 %v1064_v53  ;;  %v1006_v54 = vadd.f32 %v3129_v1, %v1005_v10  ;;  %v1027_v35 = vadd.f32 %v2334_v60, %v1026_v44  ;;  %v2360_v40 = vpop.eup %2359  ;;  %v4197_v60 = vpack.c.bf16 %v3020_v30, %v3013_v59  ;;  %v4200_v59 = vpack.c.bf16 %v3043_v49, %v4199_v33 }
 0x302   : > { %v1078_v25 = vpack.c.bf16 %v2360_v40, %v2358_v62  ;;  %v4203_v49 = vpack.c.bf16 %v3091_v37, %v3082_v15  ;;  %v4206_v15 = vpack.c.bf16 %v3137_v19, %v3129_v1 }
 0x303   : > { %v2362_v58 = vpop.eup %2361  ;;  %v1007_v39 = vadd.f32 %v3137_v19, %v1006_v54  ;;  %v1028_v47 = vadd.f32 %v2336_v6, %v1027_v35 }
 0x304   : > { %1100 = vmatpush1.bf16.msra.mxu0 %v4196_v21  ;;  %v2364_v52 = vpop.eup %2363 }
 0x305   : > { %1101 = vmatprep.subr.bf16.mxu0 %v1066_v45  ;;  %v2366_v53 = vpop.eup %2365  ;;  %v1008_v22 = vadd.f32 %v3142_v31, %v1007_v39  ;;  %v1029_v5 = vadd.f32 %v2338_v9, %v1028_v47  ;;  %v1080_v26 = vpack.c.bf16 %v2364_v52, %v2362_v58 }
 0x306   : > { %v2368_v3 = vpop.eup %2367 }
 0x307   : > { %v2370_v17 = vpop.eup %2369  ;;  %v1009_v43 = vadd.f32 %v3150_v24, %v1008_v22  ;;  %v1030_v55 = vadd.f32 %v2340_v29, %v1029_v5  ;;  %v1082_v18 = vpack.c.bf16 %v2368_v3, %v2366_v53  ;;  %v4201_v29 = vpack.c.bf16 %v3054_v23, %v3048_v34 }
 0x308   : > { %1102 = vmatpush1.bf16.msra.mxu0 %v4197_v60  ;;  %v2372_v6 = vpop.eup %2371  ;;  %v4204_v34 = vpack.c.bf16 %v3106_v63, %v3099_v20  ;;  %v4207_v20 = vpack.c.bf16 %v3150_v24, %v3142_v31  ;;  %v4208_v63 = vld [vmem:[#allocation3_spill] sm:$0xff] }
 0x309   : > { %1103 = vmatprep.subr.bf16.mxu0 %v1068_v46  ;;  %v1031_v45 = vadd.f32 %v2342_v2, %v1030_v55  ;;  %v1084_v51 = vpack.c.bf16 %v2372_v6, %v2370_v17  ;;  %v1010_v48 = vrot.slane %v1009_v43, 4 }
 0x30b   : > { %v1032_v9 = vadd.f32 %v2344_v41, %v1031_v45  ;;  %v1011_v19 = vadd.f32 %v1010_v48, %v1009_v43  ;;  %v4213_v45 = vmov 0  }
 0x30c   : > { %1104 = vmatpush1.bf16.msra.mxu0 %v4198_v32 }
 0x30d   : > { %1105 = vmatprep.subr.bf16.mxu0 %v1070_v28  ;;  %v1033_v8 = vadd.f32 %v2346_v14, %v1032_v9 }
 0x30f   : > { %v1034_v30 = vadd.f32 %v2348_v57, %v1033_v8 }
 0x310   : > { %1106 = vmatpush1.bf16.msra.mxu0 %v4200_v59 }
 0x311   : > { %1107 = vmatprep.subr.bf16.mxu0 %v1072_v16  ;;  %v1035_v12 = vadd.f32 %v2350_v61, %v1034_v30  ;;  %v1085_v16 = vrot.slane %v4208_v63, 2 }
 0x313   : > { %v1036_v2 = vadd.f32 %v2352_v56, %v1035_v12  ;;  %v4209_v56 = vmov 0.0  }
 0x314   : > { %1108 = vmatpush1.bf16.msra.mxu0 %v4201_v29 }
 0x315   : > { %1109 = vmatprep.subr.bf16.mxu0 %v1074_v36  ;;  %v1037_v46 = vadd.f32 %v2354_v50, %v1036_v2  ;;  %v1012_v50 = vrot.slane %v1011_v19, 2 }
 0x317   : > { %v1038_v27 = vadd.f32 %v2356_v38, %v1037_v46  ;;  %v1013_v44 = vadd.f32 %v1012_v50, %v1011_v19 }
 0x318   : > { %1110 = vmatpush1.bf16.msra.mxu0 %v4202_v13  ;;  %v2023_v13 = vld [vmem:[%s4005_s8] sm:$0xf] }
 0x319   : > { %1111 = vmatprep.subr.bf16.mxu0 %v1076_v0  ;;  %v1039_v41 = vadd.f32 %v2358_v62, %v1038_v27  ;;  %v1014_v31 = vrot.slane %v1013_v44, 1 }
 0x31b   : > { %v1040_v14 = vadd.f32 %v2360_v40, %v1039_v41  ;;  %v1015_v38 = vadd.f32 %v1014_v31, %v1013_v44 }
 0x31c   : > { %1112 = vmatpush1.bf16.msra.mxu0 %v4203_v49 }
 0x31d   : > { %1113 = vmatprep.subr.bf16.mxu0 %v1078_v25  ;;  %v1041_v28 = vadd.f32 %v2362_v58, %v1040_v14  ;;  %2373 = vrcp.f32 %v1015_v38  ;;  %v1134_v25 = vld [vmem:[%s4000_s3] sm:$0xf] }
 0x31f   : > { %v1042_v23 = vadd.f32 %v2364_v52, %v1041_v28 }
 0x320   : > { %1114 = vmatpush1.bf16.msra.mxu0 %v4204_v34 }
 0x321   : > { %1115 = vmatprep.subr.bf16.mxu0 %v1080_v26  ;;  %v1043_v57 = vadd.f32 %v2366_v53, %v1042_v23 }
 0x323   : > { %v1044_v4 = vadd.f32 %v2368_v3, %v1043_v57  ;;  %v2509_v3 = vld [vmem:[%s2592_s16] sm:$0xff] }
 0x324   : > { %1116 = vmatpush1.bf16.msra.mxu0 %v4205_v11 }
 0x325   : > { %1117 = vmatprep.subr.bf16.mxu0 %v1082_v18  ;;  %v1045_v61 = vadd.f32 %v2370_v17, %v1044_v4  ;;  %v4211_v17 = vld [vmem:[#allocation2_spill] sm:$0xff] }
 0x327   : > { %v1046_v37 = vadd.f32 %v2372_v6, %v1045_v61  ;;  %v2374_v54 = vpop.eup %2373  ;;  %v1227_v6 = vld [vmem:[%s4002_s5] sm:$0x3f] }
 0x328   : > { %1118 = vmatpush1.bf16.msra.mxu0 %v4206_v15 }
 0x329   : > { %1119 = vmatprep.subr.bf16.mxu0 %v1084_v51  ;;  %v1047_v42 = vrot.slane %v1046_v37, 4  ;;  %v1232_v51 = vpop.permute.xlu0 %1231 }
 0x32b   : > { %v1048_v1 = vadd.f32 %v1047_v42, %v1046_v37 }
 0x32c   : > { %1120 = vmatpush1.bf16.msra.mxu0 %v4207_v20 }
 0x32d   : > { %v1049_v10 = vrot.slane %v1048_v1, 2 }
 0x32f   : > { %1122 = vmatmul.mubr.bf16.vlgmr.msra.gmra.mrb[0].mxu0 %v1085_v16  ;;  %v1050_v36 = vadd.f32 %v1049_v10, %v1048_v1 }
 0x330   : > { %1215 = vmatprep.mubr.f32.mxu0 %v4209_v56 }
 0x331   : > { %v1051_v24 = vrot.slane %v1050_v36, 1 }
 0x333   : > { %v1052_v62 = vadd.f32 %v1051_v24, %v1050_v36 }
 0x335   : > { %2375 = vrcp.f32 %v1052_v62 }
 0x33f   : > { %v2376_v0 = vpop.eup %2375 }
 0x37f   : > { %v1139_v52 = vpop.permute.xlu1 %1138 }
 0x402   : > { %v1123_v35 = vpop.f32.mrb[0].mxu0 }
 0x403   : > { %v1132_v40 = vmul.f32 %v2374_v54, %v1123_v35  ;;  %v1125_v21 = vpop.f32.mrb[1].mxu0 }
 0x404   : > { %v1133_v58 = vmul.f32 %v2376_v0, %v1125_v21  ;;  %v1127_v39 = vpop.f32.mrb[2].mxu0 }
 0x405   : > { %v1128_v47 = vpop.f32.mrb[3].mxu0 }
 0x406   : > { %2202 = vmatprep.subr.msk.mxu0 %vm1144_vm4, %v1133_v58 }
 0x407   : > { %2203 = vmatpush1.msk.msra.mxu0 %vm1144_vm4, %v1132_v40 }
 0x408   : > { %2204 = vmatmul.mubr.msk.f32.vlgmr.msra.gmra.mrb[4].mxu0 %vm464_vm3, %v1134_v25 }
 0x409   : > { %1307 = vmatprep.mubr.f32.mxu0 %v4209_v56 }
 0x4db   : > { %v1217_v53 = vpop.f32.mrb[4].mxu0 }
 0x4dc   : > { %v1218_v22 = vadd.f32 %v1217_v53, %v1139_v52  ;;  %v1219_v5 = vpop.f32.mrb[5].mxu0 }
 0x4dd   : > { %v1220_v26 = vadd.f32 %v1219_v5, %v1139_v52 }
 0x4de   : > { %v3288_v60 = vadd.f32 %v2509_v3, %v1218_v22 }
 0x4df   : > { %v3291_v43 = vadd.f32 %v1220_v26, %v4211_v17 }
 0x4e0   : > { %4210 = vst [vmem:[#allocation5_spill] sm:$0xff] %v3288_v60  ;;  %v4057_v18 = vmax.f32 %v3288_v60, 0.0 }
 0x4e1   : > { %4212 = vst [vmem:[#allocation6_spill] sm:$0xff] %v3291_v43  ;;  %v4056_v55 = vmax.f32 %v3291_v43, 0.0 }
 0x4e3   : > { %2205 = vmatprep.subr.msk.mxu0 %vm348_vm0, %v4056_v55 }
 0x4e4   : > { %2206 = vmatpush1.msk.msra.mxu0 %vm348_vm0, %v4057_v18 }
 0x4e5   : > { %2207 = vmatmul.mubr.msk.f32.vlgmr.msra.gmra.mrb[6].mxu0 %vm344_vm1, %v1227_v6 }
 0x4e6   : > { %1440 = vmatprep.mubr.bf16.mxu0 %v4213_v45 }
 0x5b8   : > { %v1309_v32 = vpop.f32.mrb[6].mxu0 }
 0x5b9   : > { %v1310_v9 = vadd.f32 %v1309_v32, %v1232_v51  ;;  %v1311_v8 = vpop.f32.mrb[7].mxu0 }
 0x5ba   : > { %v1312_v33 = vadd.f32 %v1311_v8, %v1232_v51 }
 0x5bb   : > { %v3306_v59 = vpack.c.bf16 %v1310_v9, %v1310_v9 }
 0x5bc   : > { %v1315_v30 = vpack.c.bf16 %v1312_v33, %v1312_v33 }
 0x5bd   : > { %4214 = vst [vmem:[#allocation7_spill] sm:$0xff] %v3306_v59  ;;  %v1318_v12 = vrot.slane %v3306_v59, 1  ;;  %v1403_v29 = vsel %vm513_vm2, %v3306_v59, 0 }
 0x5be   : > { %v1319_v2 = vrot.slane %v1315_v30, 1  ;;  %2208 = vmatprep.subr.msk.bf16.mxu0 %vm513_vm2, %v1315_v30  ;;  %v1974_v46 = vrot.slane %v1315_v30, 2 }
 0x5bf   : > { %1409 = vmatpush1.bf16.msra.mxu0 %v1403_v29  ;;  %1322 = vxpose.xlu1.c.b16.start.end [1/1] (short) %v1318_v12, 128 }
 0x5c0   : > { %2009 = vmatprep.mubr.bf16.mxu1 %v1974_v46  ;;  %1338 = vxpose.xlu0.c.b16.start.end [1/1] (short) %v1319_v2, 128 }
 0x5df   : > { %2026 = vperm.xlu1 %2243, %v2023_v13  }
 0x625   : > { %v1330_v27 = vpop.trf.xlu1 }
 0x626   : > { %2209 = vmatmul.mubr.msk.bf16.vlgmr.msra.gmra.mrb[8].mxu0 %vm464_vm3, %v1330_v27  ;;  %v1346_v11 = vpop.trf.xlu0 }
 0x627   : > { %1450 = vmatprep.mubr.bf16.mxu0 %v4213_v45 }
 0x629   : > { %v1331_v41 = vpop.trf.xlu1 }
 0x62a   : > { %v1347_v4 = vpop.trf.xlu0 }
 0x62d   : > { %v1332_v49 = vpop.trf.xlu1 }
 0x62e   : > { %2210 = vmatmul.mubr.msk.bf16.gmra.mrb[12].mxu0 %vm464_vm3, %v1331_v41  ;;  %v1348_v61 = vpop.trf.xlu0 }
 0x62f   : > { %1460 = vmatprep.mubr.bf16.mxu0 %v4213_v45 }
 0x631   : > { %v1333_v14 = vpop.trf.xlu1 }
 0x632   : > { %v1349_v15 = vpop.trf.xlu0 }
 0x635   : > { %v1334_v28 = vpop.trf.xlu1 }
 0x636   : > { %2211 = vmatmul.mubr.msk.bf16.gmra.mrb[16].mxu0 %vm464_vm3, %v1332_v49  ;;  %v1350_v37 = vpop.trf.xlu0 }
 0x637   : > { %1470 = vmatprep.mubr.bf16.mxu0 %v4213_v45 }
 0x639   : > { %v1335_v34 = vpop.trf.xlu1 }
 0x63a   : > { %v1351_v20 = vpop.trf.xlu0 }
 0x63d   : > { %v1336_v23 = vpop.trf.xlu1 }
 0x63e   : > { %2212 = vmatmul.mubr.msk.bf16.gmra.mrb[20].mxu0 %vm464_vm3, %v1333_v14  ;;  %v1352_v63 = vpop.trf.xlu0 }
 0x63f   : > { %1480 = vmatprep.mubr.bf16.mxu0 %v4213_v45 }
 0x641   : > { %v1337_v57 = vpop.trf.xlu1 }
 0x642   : > { %v1353_v16 = vpop.trf.xlu0 }
 0x646   : > { %2213 = vmatmul.mubr.msk.bf16.gmra.mrb[24].mxu0 %vm464_vm3, %v1334_v28 }
 0x647   : > { %1490 = vmatprep.mubr.bf16.mxu0 %v4213_v45 }
 0x64e   : > { %2214 = vmatmul.mubr.msk.bf16.gmra.mrb[28].mxu0 %vm464_vm3, %v1335_v34 }
 0x64f   : > { %1500 = vmatprep.mubr.bf16.mxu0 %v4213_v45 }
 0x656   : > { %2215 = vmatmul.mubr.msk.bf16.gmra.mrb[32].mxu0 %vm464_vm3, %v1336_v23 }
 0x657   : > { %1510 = vmatprep.mubr.bf16.mxu0 %v4213_v45 }
 0x65e   : > { %2216 = vmatmul.mubr.msk.bf16.gmra.mrb[36].mxu0 %vm464_vm3, %v1337_v57 }
 0x65f   : > { %1520 = vmatprep.mubr.bf16.mxu0 %v4213_v45 }
 0x666   : > { %2217 = vmatmul.mubr.msk.bf16.gmra.mrb[40].mxu0 %vm464_vm3, %v1346_v11 }
 0x667   : > { %1530 = vmatprep.mubr.bf16.mxu0 %v4213_v45 }
 0x66e   : > { %2218 = vmatmul.mubr.msk.bf16.gmra.mrb[44].mxu0 %vm464_vm3, %v1347_v4 }
 0x66f   : > { %1540 = vmatprep.mubr.bf16.mxu0 %v4213_v45 }
 0x676   : > { %2219 = vmatmul.mubr.msk.bf16.gmra.mrb[48].mxu0 %vm464_vm3, %v1348_v61 }
 0x677   : > { %1550 = vmatprep.mubr.bf16.mxu0 %v4213_v45 }
 0x67e   : > { %2220 = vmatmul.mubr.msk.bf16.gmra.mrb[52].mxu0 %vm464_vm3, %v1349_v15 }
 0x67f   : > { %1560 = vmatprep.mubr.bf16.mxu0 %v4213_v45 }
 0x686   : > { %2221 = vmatmul.mubr.msk.bf16.gmra.mrb[56].mxu0 %vm464_vm3, %v1350_v37 }
 0x687   : > { %1570 = vmatprep.mubr.bf16.mxu0 %v4213_v45 }
 0x68e   : > { %2222 = vmatmul.mubr.msk.bf16.gmra.mrb[60].mxu0 %vm464_vm3, %v1351_v20 }
 0x68f   : > { %1580 = vmatprep.mubr.bf16.mxu0 %v4213_v45 }
 0x696   : > { %2223 = vmatmul.mubr.msk.bf16.gmra.mrb[64].mxu0 %vm464_vm3, %v1352_v63 }
 0x697   : > { %1590 = vmatprep.mubr.bf16.mxu0 %v4213_v45 }
 0x69e   : > { %2224 = vmatmul.mubr.msk.bf16.gmra.mrb[68].mxu0 %vm464_vm3, %v1353_v16 }
 0x6f9   : > { %v3346_v7 = vpop.f32.mrb[8].mxu0 }
 0x6fa   : > { %v3348_v48 = vpop.f32.mrb[9].mxu0 }
 0x6fb   : > { %v3350_v42 = vpop.f32.mrb[10].mxu0 }
 0x6fc   : > { %v3352_v19 = vpop.f32.mrb[11].mxu0 }
 0x701   : > { %v3354_v1 = vpop.f32.mrb[12].mxu0 }
 0x702   : > { %v1601_v50 = vmax.f32 %v3346_v7, %v3354_v1  ;;  %v3358_v10 = vpop.f32.mrb[13].mxu0 }
 0x703   : > { %v1638_v44 = vmax.f32 %v3348_v48, %v3358_v10  ;;  %v3362_v36 = vpop.f32.mrb[14].mxu0 }
 0x704   : > { %v1602_v31 = vmax.f32 %v3350_v42, %v3362_v36  ;;  %v3366_v24 = vpop.f32.mrb[15].mxu0 }
 0x705   : > { %v1639_v38 = vmax.f32 %v3352_v19, %v3366_v24 }
 0x709   : > { %v3370_v62 = vpop.f32.mrb[16].mxu0 }
 0x70a   : > { %v1603_v54 = vmax.f32 %v1601_v50, %v3370_v62  ;;  %v3373_v35 = vpop.f32.mrb[17].mxu0 }
 0x70b   : > { %v1640_v0 = vmax.f32 %v1638_v44, %v3373_v35  ;;  %v3376_v40 = vpop.f32.mrb[18].mxu0 }
 0x70c   : > { %v1604_v21 = vmax.f32 %v1602_v31, %v3376_v40  ;;  %v3379_v58 = vpop.f32.mrb[19].mxu0 }
 0x70d   : > { %v1641_v39 = vmax.f32 %v1639_v38, %v3379_v58 }
 0x711   : > { %v3382_v47 = vpop.f32.mrb[20].mxu0 }
 0x712   : > { %v1605_v25 = vmax.f32 %v1603_v54, %v3382_v47  ;;  %v3385_v52 = vpop.f32.mrb[21].mxu0 }
 0x713   : > { %v1642_v53 = vmax.f32 %v1640_v0, %v3385_v52  ;;  %v3388_v22 = vpop.f32.mrb[22].mxu0 }
 0x714   : > { %v1606_v5 = vmax.f32 %v1604_v21, %v3388_v22  ;;  %v3391_v26 = vpop.f32.mrb[23].mxu0 }
 0x715   : > { %v1643_v3 = vmax.f32 %v1641_v39, %v3391_v26 }
 0x719   : > { %v3394_v6 = vpop.f32.mrb[24].mxu0 }
 0x71a   : > { %v1607_v45 = vmax.f32 %v1605_v25, %v3394_v6  ;;  %v3397_v51 = vpop.f32.mrb[25].mxu0 }
 0x71b   : > { %v1644_v32 = vmax.f32 %v1642_v53, %v3397_v51  ;;  %v3400_v9 = vpop.f32.mrb[26].mxu0 }
 0x71c   : > { %v1608_v8 = vmax.f32 %v1606_v5, %v3400_v9  ;;  %v3403_v33 = vpop.f32.mrb[27].mxu0 }
 0x71d   : > { %v1645_v30 = vmax.f32 %v1643_v3, %v3403_v33 }
 0x721   : > { %v3406_v12 = vpop.f32.mrb[28].mxu0 }
 0x722   : > { %v1609_v29 = vmax.f32 %v1607_v45, %v3406_v12  ;;  %v3409_v2 = vpop.f32.mrb[29].mxu0 }
 0x723   : > { %v1646_v46 = vmax.f32 %v1644_v32, %v3409_v2  ;;  %v3412_v13 = vpop.f32.mrb[30].mxu0 }
 0x724   : > { %v1610_v27 = vmax.f32 %v1608_v8, %v3412_v13  ;;  %v3415_v41 = vpop.f32.mrb[31].mxu0 }
 0x725   : > { %4215 = vst [vmem:[#allocation8_spill] sm:$0xff] %v3415_v41  ;;  %v1647_v49 = vmax.f32 %v1645_v30, %v3415_v41 }
 0x729   : > { %v3418_v14 = vpop.f32.mrb[32].mxu0 }
 0x72a   : > { %v1611_v28 = vmax.f32 %v1609_v29, %v3418_v14  ;;  %v3421_v34 = vpop.f32.mrb[33].mxu0 }
 0x72b   : > { %4216 = vst [vmem:[#allocation9_spill] sm:$0xff] %v3421_v34  ;;  %v1648_v23 = vmax.f32 %v1646_v46, %v3421_v34  ;;  %v3424_v57 = vpop.f32.mrb[34].mxu0 }
 0x72c   : > { %v1612_v11 = vmax.f32 %v1610_v27, %v3424_v57  ;;  %v3427_v4 = vpop.f32.mrb[35].mxu0 }
 0x72d   : > { %4217 = vst [vmem:[#allocation10_spill] sm:$0xff] %v3427_v4  ;;  %v1649_v61 = vmax.f32 %v1647_v49, %v3427_v4 }
 0x731   : > { %v3430_v15 = vpop.f32.mrb[36].mxu0 }
 0x732   : > { %v1613_v37 = vmax.f32 %v1611_v28, %v3430_v15  ;;  %v3433_v20 = vpop.f32.mrb[37].mxu0 }
 0x733   : > { %4218 = vst [vmem:[#allocation11_spill] sm:$0xff] %v3433_v20  ;;  %v1650_v63 = vmax.f32 %v1648_v23, %v3433_v20  ;;  %v3436_v16 = vpop.f32.mrb[38].mxu0 }
 0x734   : > { %v1614_v50 = vmax.f32 %v1612_v11, %v3436_v16  ;;  %v3439_v44 = vpop.f32.mrb[39].mxu0 }
 0x735   : > { %4219 = vst [vmem:[#allocation12_spill] sm:$0xff] %v3439_v44  ;;  %v1651_v31 = vmax.f32 %v1649_v61, %v3439_v44 }
 0x739   : > { %v3442_v38 = vpop.f32.mrb[40].mxu0 }
 0x73a   : > { %v1615_v54 = vmax.f32 %v1613_v37, %v3442_v38  ;;  %v3445_v0 = vpop.f32.mrb[41].mxu0 }
 0x73b   : > { %4220 = vst [vmem:[#allocation13_spill] sm:$0xff] %v3445_v0  ;;  %v1652_v21 = vmax.f32 %v1650_v63, %v3445_v0  ;;  %v3448_v39 = vpop.f32.mrb[42].mxu0 }
 0x73c   : > { %v1616_v25 = vmax.f32 %v1614_v50, %v3448_v39  ;;  %v3451_v53 = vpop.f32.mrb[43].mxu0 }
 0x73d   : > { %4221 = vst [vmem:[#allocation14_spill] sm:$0xff] %v3451_v53  ;;  %v1653_v5 = vmax.f32 %v1651_v31, %v3451_v53 }
 0x741   : > { %v3454_v3 = vpop.f32.mrb[44].mxu0 }
 0x742   : > { %v1617_v45 = vmax.f32 %v1615_v54, %v3454_v3  ;;  %v3457_v32 = vpop.f32.mrb[45].mxu0 }
 0x743   : > { %4222 = vst [vmem:[#allocation15_spill] sm:$0xff] %v3457_v32  ;;  %v1654_v8 = vmax.f32 %v1652_v21, %v3457_v32  ;;  %v3460_v30 = vpop.f32.mrb[46].mxu0 }
 0x744   : > { %v1618_v29 = vmax.f32 %v1616_v25, %v3460_v30  ;;  %v3463_v46 = vpop.f32.mrb[47].mxu0 }
 0x745   : > { %4223 = vst [vmem:[#allocation16_spill] sm:$0xff] %v3463_v46  ;;  %v1655_v27 = vmax.f32 %v1653_v5, %v3463_v46 }
 0x749   : > { %v3466_v49 = vpop.f32.mrb[48].mxu0 }
 0x74a   : > { %v1619_v28 = vmax.f32 %v1617_v45, %v3466_v49  ;;  %v3469_v23 = vpop.f32.mrb[49].mxu0 }
 0x74b   : > { %4224 = vst [vmem:[#allocation17_spill] sm:$0xff] %v3469_v23  ;;  %v1656_v11 = vmax.f32 %v1654_v8, %v3469_v23  ;;  %v3472_v61 = vpop.f32.mrb[50].mxu0 }
 0x74c   : > { %v1620_v37 = vmax.f32 %v1618_v29, %v3472_v61  ;;  %v3475_v63 = vpop.f32.mrb[51].mxu0 }
 0x74d   : > { %4225 = vst [vmem:[#allocation18_spill] sm:$0xff] %v3475_v63  ;;  %v1657_v50 = vmax.f32 %v1655_v27, %v3475_v63 }
 0x751   : > { %v3478_v31 = vpop.f32.mrb[52].mxu0 }
 0x752   : > { %v1621_v54 = vmax.f32 %v1619_v28, %v3478_v31  ;;  %v3481_v21 = vpop.f32.mrb[53].mxu0 }
 0x753   : > { %4226 = vst [vmem:[#allocation20_spill] sm:$0xff] %v3481_v21  ;;  %v1658_v25 = vmax.f32 %v1656_v11, %v3481_v21  ;;  %v3484_v5 = vpop.f32.mrb[54].mxu0 }
 0x754   : > { %v1622_v45 = vmax.f32 %v1620_v37, %v3484_v5  ;;  %v3487_v8 = vpop.f32.mrb[55].mxu0 }
 0x755   : > { %4227 = vst [vmem:[#allocation22_spill] sm:$0xff] %v3487_v8  ;;  %v1659_v29 = vmax.f32 %v1657_v50, %v3487_v8 }
 0x759   : > { %v3490_v55 = vpop.f32.mrb[56].mxu0 }
 0x75a   : > { %v1623_v27 = vmax.f32 %v1621_v54, %v3490_v55  ;;  %v3493_v18 = vpop.f32.mrb[57].mxu0 }
 0x75b   : > { %4228 = vst [vmem:[#allocation23_spill] sm:$0xff] %v3493_v18  ;;  %v1660_v28 = vmax.f32 %v1658_v25, %v3493_v18  ;;  %v3496_v17 = vpop.f32.mrb[58].mxu0 }
 0x75c   : > { %v1624_v11 = vmax.f32 %v1622_v45, %v3496_v17  ;;  %v3499_v43 = vpop.f32.mrb[59].mxu0 }
 0x75d   : > { %4229 = vst [vmem:[#allocation19_spill] sm:$0xff] %v3499_v43  ;;  %v1661_v37 = vmax.f32 %v1659_v29, %v3499_v43 }
 0x761   : > { %v3502_v60 = vpop.f32.mrb[60].mxu0 }
 0x762   : > { %v1625_v50 = vmax.f32 %v1623_v27, %v3502_v60  ;;  %v3505_v56 = vpop.f32.mrb[61].mxu0 }
 0x763   : > { %4230 = vst [vmem:[#allocation21_spill] sm:$0xff] %v3505_v56  ;;  %v1662_v54 = vmax.f32 %v1660_v28, %v3505_v56  ;;  %v3508_v59 = vpop.f32.mrb[62].mxu0 }
 0x764   : > { %v1626_v25 = vmax.f32 %v1624_v11, %v3508_v59  ;;  %v3511_v18 = vpop.f32.mrb[63].mxu0 }
 0x765   : > { %4231 = vst [vmem:[#allocation24_spill] sm:$0xff] %v3511_v18  ;;  %v1663_v45 = vmax.f32 %v1661_v37, %v3511_v18 }
 0x769   : > { %v3514_v8 = vpop.f32.mrb[64].mxu0 }
 0x76a   : > { %v1627_v29 = vmax.f32 %v1625_v50, %v3514_v8  ;;  %v3517_v43 = vpop.f32.mrb[65].mxu0 }
 0x76b   : > { %4232 = vst [vmem:[#allocation4_spill] sm:$0xff] %v3517_v43  ;;  %v1664_v27 = vmax.f32 %v1662_v54, %v3517_v43  ;;  %v3520_v21 = vpop.f32.mrb[66].mxu0 }
 0x76c   : > { %v1628_v28 = vmax.f32 %v1626_v25, %v3520_v21  ;;  %v3523_v56 = vpop.f32.mrb[67].mxu0 }
 0x76d   : > { %4233 = vst [vmem:[#allocation3_spill] sm:$0xff] %v3523_v56  ;;  %v1665_v11 = vmax.f32 %v1663_v45, %v3523_v56 }
 0x771   : > { %v3526_v63 = vpop.f32.mrb[68].mxu0 }
 0x772   : > { %v1629_v37 = vmax.f32 %v1627_v29, %v3526_v63  ;;  %v3529_v18 = vpop.f32.mrb[69].mxu0 }
 0x773   : > { %4234 = vst [vmem:[#allocation25_spill] sm:$0xff] %v3529_v18  ;;  %v1666_v50 = vmax.f32 %v1664_v27, %v3529_v18  ;;  %v3532_v23 = vpop.f32.mrb[70].mxu0 }
 0x774   : > { %v1630_v54 = vmax.f32 %v1628_v28, %v3532_v23  ;;  %v3535_v43 = vpop.f32.mrb[71].mxu0 }
 0x775   : > { %4235 = vst [vmem:[#allocation26_spill] sm:$0xff] %v3535_v43  ;;  %v1667_v25 = vmax.f32 %v1665_v11, %v3535_v43 }
 0x776   : > { %v1631_v46 = vmax.f32 %v1629_v37, %v1630_v54 }
 0x777   : > { %v1668_v32 = vmax.f32 %v1666_v50, %v1667_v25 }
 0x778   : > { %v1632_v53 = vrot.slane %v1631_v46, 4 }
 0x779   : > { %v1669_v45 = vrot.slane %v1668_v32, 4 }
 0x77a   : > { %v1633_v56 = vmax.f32 %v1631_v46, %v1632_v53 }
 0x77b   : > { %v1670_v0 = vmax.f32 %v1668_v32, %v1669_v45 }
 0x77c   : > { %v1634_v44 = vrot.slane %v1633_v56, 2 }
 0x77d   : > { %v1671_v29 = vrot.slane %v1670_v0, 2 }
 0x77e   : > { %v1635_v20 = vmax.f32 %v1633_v56, %v1634_v44  ;;  %v4255_v44 = vld [vmem:[#allocation25_spill] sm:$0xff] }
 0x77f   : > { %v1672_v4 = vmax.f32 %v1670_v0, %v1671_v29 }
 0x780   : > { %v1636_v34 = vrot.slane %v1635_v20, 1 }
 0x781   : > { %v1673_v27 = vrot.slane %v1672_v4, 1 }
 0x782   : > { %v3538_v18 = vmax.f32 %v1635_v20, %v1636_v34 }
 0x783   : > { %v3540_v41 = vmax.f32 %v1672_v4, %v1673_v27 }
 0x784   : > { %v1675_v28 = vsub.f32 %v3346_v7, %v3538_v18  ;;  %v1677_v11 = vsub.f32 %v3350_v42, %v3538_v18  ;;  %v1679_v53 = vsub.f32 %v3354_v1, %v3538_v18  ;;  %v1681_v32 = vsub.f32 %v3362_v36, %v3538_v18 }
 0x785   : > { %v1683_v56 = vsub.f32 %v3370_v62, %v3538_v18  ;;  %v1685_v34 = vsub.f32 %v3376_v40, %v3538_v18  ;;  %v1687_v4 = vsub.f32 %v3382_v47, %v3538_v18  ;;  %v1689_v7 = vsub.f32 %v3388_v22, %v3538_v18 }
 0x786   : > { %v1691_v42 = vsub.f32 %v3394_v6, %v3538_v18  ;;  %v1693_v1 = vsub.f32 %v3400_v9, %v3538_v18  ;;  %v1695_v36 = vsub.f32 %v3406_v12, %v3538_v18  ;;  %v1697_v62 = vsub.f32 %v3412_v13, %v3538_v18 }
 0x787   : > { %v1699_v40 = vsub.f32 %v3418_v14, %v3538_v18  ;;  %v1701_v47 = vsub.f32 %v3424_v57, %v3538_v18  ;;  %v1703_v22 = vsub.f32 %v3430_v15, %v3538_v18  ;;  %v1705_v6 = vsub.f32 %v3436_v16, %v3538_v18 }
 0x788   : > { %v1707_v9 = vsub.f32 %v3442_v38, %v3538_v18  ;;  %v1709_v12 = vsub.f32 %v3448_v39, %v3538_v18  ;;  %v1711_v13 = vsub.f32 %v3454_v3, %v3538_v18  ;;  %v1713_v14 = vsub.f32 %v3460_v30, %v3538_v18 }
 0x789   : > { %v1715_v57 = vsub.f32 %v3466_v49, %v3538_v18  ;;  %v1717_v15 = vsub.f32 %v3472_v61, %v3538_v18  ;;  %v1719_v20 = vsub.f32 %v3478_v31, %v3538_v18  ;;  %v1721_v16 = vsub.f32 %v3484_v5, %v3538_v18 }
 0x78a   : > { %v1739_v61 = vmul.f32 1.442695, %v1675_v28  ;;  %v1743_v31 = vmul.f32 1.442695, %v1677_v11  ;;  %v1747_v5 = vmul.f32 1.442695, %v1679_v53 }
 0x78b   : > { %v1751_v50 = vmul.f32 1.442695, %v1681_v32  ;;  %v1755_v25 = vmul.f32 1.442695, %v1683_v56  ;;  %v1759_v45 = vmul.f32 1.442695, %v1685_v34 }
 0x78c   : > { %2377 = vpow2.f32 %v1739_v61  ;;  %v1763_v29 = vmul.f32 1.442695, %v1687_v4  ;;  %v1767_v27 = vmul.f32 1.442695, %v1689_v7  ;;  %v1771_v46 = vmul.f32 1.442695, %v1691_v42 }
 0x78d   : > { %2379 = vpow2.f32 %v1743_v31  ;;  %v1775_v49 = vmul.f32 1.442695, %v1693_v1  ;;  %v1779_v28 = vmul.f32 1.442695, %v1695_v36  ;;  %v1783_v11 = vmul.f32 1.442695, %v1697_v62 }
 0x78e   : > { %2381 = vpow2.f32 %v1747_v5  ;;  %v1787_v53 = vmul.f32 1.442695, %v1699_v40  ;;  %v1791_v37 = vmul.f32 1.442695, %v1701_v47  ;;  %v1795_v32 = vmul.f32 1.442695, %v1703_v22 }
 0x78f   : > { %2383 = vpow2.f32 %v1751_v50  ;;  %v1799_v30 = vmul.f32 1.442695, %v1705_v6  ;;  %v1803_v54 = vmul.f32 1.442695, %v1707_v9  ;;  %v1807_v61 = vmul.f32 1.442695, %v1709_v12 }
 0x790   : > { %2385 = vpow2.f32 %v1755_v25  ;;  %v1811_v56 = vmul.f32 1.442695, %v1711_v13  ;;  %v1815_v34 = vmul.f32 1.442695, %v1713_v14  ;;  %v1819_v31 = vmul.f32 1.442695, %v1715_v57 }
 0x791   : > { %2387 = vpow2.f32 %v1759_v45  ;;  %v3610_v4 = vmul.f32 1.442695, %v1717_v15  ;;  %v3612_v7 = vmul.f32 1.442695, %v1719_v20  ;;  %v3614_v42 = vmul.f32 1.442695, %v1721_v16 }
 0x792   : > { %2389 = vpow2.f32 %v1763_v29  ;;  %v4236_v57 = vld [vmem:[#allocation8_spill] sm:$0xff]  ;;  %v4238_v5 = vld [vmem:[#allocation10_spill] sm:$0xff]  ;;  %v4239_v45 = vld [vmem:[#allocation11_spill] sm:$0xff] }
 0x793   : > { %2391 = vpow2.f32 %v1767_v27  ;;  %v4240_v27 = vld [vmem:[#allocation12_spill] sm:$0xff]  ;;  %v4242_v14 = vld [vmem:[#allocation14_spill] sm:$0xff]  ;;  %v4243_v13 = vld [vmem:[#allocation15_spill] sm:$0xff] }
 0x794   : > { %2393 = vpow2.f32 %v1771_v46  ;;  %v4237_v46 = vld [vmem:[#allocation9_spill] sm:$0xff]  ;;  %v4244_v29 = vld [vmem:[#allocation16_spill] sm:$0xff]  ;;  %v4246_v22 = vld [vmem:[#allocation18_spill] sm:$0xff] }
 0x795   : > { %2395 = vpow2.f32 %v1775_v49  ;;  %v4245_v6 = vld [vmem:[#allocation17_spill] sm:$0xff]  ;;  %v4247_v50 = vld [vmem:[#allocation20_spill] sm:$0xff]  ;;  %v4248_v62 = vld [vmem:[#allocation22_spill] sm:$0xff] }
 0x796   : > { %v3624_v47 = vpop.eup %2377  ;;  %2397 = vpow2.f32 %v1779_v28  ;;  %v4249_v28 = vld [vmem:[#allocation23_spill] sm:$0xff] }
 0x797   : > { %v3632_v12 = vpop.eup %2379  ;;  %2399 = vpow2.f32 %v1783_v11  ;;  %v4241_v11 = vld [vmem:[#allocation13_spill] sm:$0xff]  ;;  %v4250_v1 = vld [vmem:[#allocation19_spill] sm:$0xff] }
 0x798   : > { %v3640_v20 = vpop.eup %2381  ;;  %2401 = vpow2.f32 %v1787_v53  ;;  %v1867_v16 = vadd.f32 %v3632_v12, %v3624_v47  ;;  %v4254_v53 = vld [vmem:[#allocation3_spill] sm:$0xff] }
 0x799   : > { %v3648_v25 = vpop.eup %2383  ;;  %2403 = vpow2.f32 %v1791_v37  ;;  %v4252_v37 = vld [vmem:[#allocation24_spill] sm:$0xff] }
 0x79a   : > { %v3656_v15 = vpop.eup %2385  ;;  %2405 = vpow2.f32 %v1795_v32  ;;  %v1868_v49 = vadd.f32 %v3640_v20, %v1867_v16 }
 0x79b   : > { %v3663_v9 = vpop.eup %2387  ;;  %2407 = vpow2.f32 %v1799_v30 }
 0x79c   : > { %v3671_v40 = vpop.eup %2389  ;;  %2409 = vpow2.f32 %v1803_v54  ;;  %v1869_v16 = vadd.f32 %v3648_v25, %v1868_v49 }
 0x79d   : > { %v3678_v36 = vpop.eup %2391  ;;  %2411 = vpow2.f32 %v1807_v61 }
 0x79e   : > { %v3686_v39 = vpop.eup %2393  ;;  %2413 = vpow2.f32 %v1811_v56  ;;  %v1870_v49 = vadd.f32 %v3656_v15, %v1869_v16  ;;  %v4256_v16 = vsub.f32 %v3490_v55, %v3538_v18 }
 0x79f   : > { %v3693_v38 = vpop.eup %2395  ;;  %2415 = vpow2.f32 %v1815_v34  ;;  %v4257_v34 = vsub.f32 %v3496_v17, %v3538_v18 }
 0x7a0   : > { %v3701_v3 = vpop.eup %2397  ;;  %2417 = vpow2.f32 %v1819_v31  ;;  %v1835_v30 = vmul.f32 1.442695, %v4256_v16  ;;  %v1871_v61 = vadd.f32 %v3663_v9, %v1870_v49  ;;  %v4258_v31 = vsub.f32 %v3502_v60, %v3538_v18 }
 0x7a1   : > { %v3707_v0 = vpop.eup %2399  ;;  %2419 = vpow2.f32 %v3610_v4  ;;  %v1839_v54 = vmul.f32 1.442695, %v4257_v34  ;;  %v4259_v4 = vsub.f32 %v3508_v59, %v3538_v18  ;;  %v4263_v59 = vsub.f32 %v3526_v63, %v3538_v18 }
 0x7a2   : > { %v3713_v32 = vpop.eup %2401  ;;  %2421 = vpow2.f32 %v3612_v7  ;;  %v1843_v56 = vmul.f32 1.442695, %v4258_v31  ;;  %v1872_v55 = vadd.f32 %v3671_v40, %v1871_v61  ;;  %v4260_v7 = vsub.f32 %v3514_v8, %v3538_v18 }
 0x7a3   : > { %v3720_v16 = vpop.eup %2403  ;;  %2423 = vpow2.f32 %v3614_v42  ;;  %v1847_v49 = vmul.f32 1.442695, %v4259_v4  ;;  %v4261_v61 = vsub.f32 %v3520_v21, %v3538_v18 }
 0x7a4   : > { %v3726_v17 = vpop.eup %2405  ;;  %2425 = vpow2.f32 %v1835_v30  ;;  %v1851_v34 = vmul.f32 1.442695, %v4260_v7  ;;  %v1873_v60 = vadd.f32 %v3678_v36, %v1872_v55  ;;  %v1859_v30 = vmul.f32 1.442695, %v4263_v59 }
 0x7a5   : > { %v3732_v31 = vpop.eup %2407  ;;  %2427 = vpow2.f32 %v1839_v54  ;;  %v1855_v42 = vmul.f32 1.442695, %v4261_v61  ;;  %v4264_v55 = vsub.f32 %v3532_v23, %v3538_v18  ;;  %v4267_v18 = vsub.f32 %v3358_v10, %v3540_v41 }
 0x7a6   : > { %v3737_v43 = vpop.eup %2409  ;;  %2429 = vpow2.f32 %v1843_v56  ;;  %v1874_v4 = vadd.f32 %v3686_v39, %v1873_v60  ;;  %v4265_v56 = vsub.f32 %v3348_v48, %v3540_v41  ;;  %v4266_v60 = vsub.f32 %v3352_v19, %v3540_v41 }
 0x7a7   : > { %4262 = vst [vmem:[#allocation8_spill] sm:$0xff] %v3737_v43  ;;  %v3743_v8 = vpop.eup %2411  ;;  %2431 = vpow2.f32 %v1847_v49  ;;  %v1863_v54 = vmul.f32 1.442695, %v4264_v55  ;;  %v1749_v23 = vmul.f32 1.442695, %v4267_v18  ;;  %v4268_v48 = vsub.f32 %v3366_v24, %v3540_v41 }
 0x7a8   : > { %v3748_v7 = vpop.eup %2413  ;;  %2433 = vpow2.f32 %v1851_v34  ;;  %v1875_v21 = vadd.f32 %v3693_v38, %v1874_v4  ;;  %v1741_v61 = vmul.f32 1.442695, %v4265_v56  ;;  %v1745_v49 = vmul.f32 1.442695, %v4266_v60 }
 0x7a9   : > { %v3754_v63 = vpop.eup %2415  ;;  %2435 = vpow2.f32 %v1855_v42  ;;  %v1753_v4 = vmul.f32 1.442695, %v4268_v48  ;;  %v4269_v42 = vsub.f32 %v3373_v35, %v3540_v41  ;;  %v4270_v19 = vsub.f32 %v3379_v58, %v3540_v41 }
 0x7aa   : > { %v3762_v59 = vpop.eup %2417  ;;  %2437 = vpow2.f32 %v1859_v30  ;;  %v1876_v34 = vadd.f32 %v3701_v3, %v1875_v21  ;;  %v4271_v30 = vsub.f32 %v3385_v52, %v3540_v41  ;;  %v4272_v21 = vsub.f32 %v3391_v26, %v3540_v41 }
 0x7ab   : > { %v1757_v55 = vmul.f32 1.442695, %v4269_v42  ;;  %v3771_v56 = vpop.eup %2419  ;;  %2439 = vpow2.f32 %v1863_v54  ;;  %v1761_v10 = vmul.f32 1.442695, %v4270_v19  ;;  %v4273_v54 = vsub.f32 %v3397_v51, %v3540_v41 }
 0x7ac   : > { %v1765_v60 = vmul.f32 1.442695, %v4271_v30  ;;  %v1769_v24 = vmul.f32 1.442695, %v4272_v21  ;;  %v3782_v18 = vpop.eup %2421  ;;  %v1877_v35 = vadd.f32 %v3707_v0, %v1876_v34  ;;  %2441 = vpow2.f32 %v1741_v61 }
 0x7ad   : > { %v1773_v48 = vmul.f32 1.442695, %v4273_v54  ;;  %v4274_v58 = vsub.f32 %v3403_v33, %v3540_v41  ;;  %v3791_v19 = vpop.eup %2423  ;;  %2443 = vpow2.f32 %v1745_v49 }
 0x7ae   : > { %v3799_v34 = vpop.eup %2425  ;;  %v1878_v51 = vadd.f32 %v3713_v32, %v1877_v35  ;;  %2445 = vpow2.f32 %v1749_v23 }
 0x7af   : > { %v1777_v42 = vmul.f32 1.442695, %v4274_v58  ;;  %v3806_v30 = vpop.eup %2427  ;;  %2447 = vpow2.f32 %v1753_v4  ;;  %v4275_v4 = vsub.f32 %v3409_v2, %v3540_v41  ;;  %v4276_v58 = vsub.f32 %v4236_v57, %v3540_v41 }
 0x7b0   : > { %v3814_v35 = vpop.eup %2429  ;;  %v1879_v23 = vadd.f32 %v3720_v16, %v1878_v51  ;;  %2449 = vpow2.f32 %v1757_v55 }
 0x7b1   : > { %v3821_v33 = vpop.eup %2431  ;;  %2451 = vpow2.f32 %v1761_v10  ;;  %v1781_v49 = vmul.f32 1.442695, %v4275_v4  ;;  %v1785_v54 = vmul.f32 1.442695, %v4276_v58 }
 0x7b2   : > { %v3829_v51 = vpop.eup %2433  ;;  %v1880_v55 = vadd.f32 %v3726_v17, %v1879_v23  ;;  %2453 = vpow2.f32 %v1765_v60  ;;  %v4277_v60 = vsub.f32 %v4237_v46, %v3540_v41  ;;  %v4282_v46 = vsub.f32 %v4242_v14, %v3540_v41 }
 0x7b3   : > { %v3837_v61 = vpop.eup %2435  ;;  %2455 = vpow2.f32 %v1769_v24  ;;  %v4278_v24 = vsub.f32 %v4238_v5, %v3540_v41  ;;  %v4281_v5 = vsub.f32 %v4241_v11, %v3540_v41  ;;  %v4285_v14 = vsub.f32 %v4245_v6, %v3540_v41 }
 0x7b4   : > { %v3842_v21 = vpop.eup %2437  ;;  %v1881_v26 = vadd.f32 %v3732_v31, %v1880_v55  ;;  %2457 = vpow2.f32 %v1773_v48  ;;  %v1789_v2 = vmul.f32 1.442695, %v4277_v60  ;;  %v4279_v48 = vsub.f32 %v4239_v45, %v3540_v41 }
 0x7b5   : > { %v3850_v4 = vpop.eup %2439  ;;  %2459 = vpow2.f32 %v1777_v42  ;;  %v1793_v57 = vmul.f32 1.442695, %v4278_v24  ;;  %v4280_v42 = vsub.f32 %v4240_v27, %v3540_v41  ;;  %v1805_v24 = vmul.f32 1.442695, %v4281_v5 }
 0x7b6   : > { %v2442_v58 = vpop.eup %2441  ;;  %v1882_v10 = vadd.f32 %v3737_v43, %v1881_v26  ;;  %2461 = vpow2.f32 %v1781_v49  ;;  %v1797_v55 = vmul.f32 1.442695, %v4279_v48  ;;  %v4283_v27 = vsub.f32 %v4243_v13, %v3540_v41 }
 0x7b7   : > { %v2444_v60 = vpop.eup %2443  ;;  %2463 = vpow2.f32 %v1785_v54  ;;  %v1801_v23 = vmul.f32 1.442695, %v4280_v42  ;;  %v1809_v54 = vmul.f32 1.442695, %v4282_v46  ;;  %v1821_v46 = vmul.f32 1.442695, %v4285_v14 }
 0x7b8   : > { %v2446_v52 = vpop.eup %2445  ;;  %v1883_v26 = vadd.f32 %v3743_v8, %v1882_v10  ;;  %2465 = vpow2.f32 %v1789_v2  ;;  %v1904_v49 = vadd.f32 %v2444_v60, %v2442_v58  ;;  %v1942_v45 = vpack.c.bf16 %v2444_v60, %v2442_v58 }
 0x7b9   : > { %v2448_v48 = vpop.eup %2447  ;;  %2467 = vpow2.f32 %v1793_v57  ;;  %v1813_v42 = vmul.f32 1.442695, %v4283_v27  ;;  %v4284_v57 = vsub.f32 %v4244_v29, %v3540_v41  ;;  %v4286_v13 = vpack.c.bf16 %v3632_v12, %v3624_v47 }
 0x7ba   : > { %v2450_v43 = vpop.eup %2449  ;;  %v1884_v11 = vadd.f32 %v3748_v7, %v1883_v26  ;;  %2469 = vpow2.f32 %v1797_v55  ;;  %v1905_v5 = vadd.f32 %v2446_v52, %v1904_v49  ;;  %1977 = vmatprep.subr.bf16.mxu1 %v1942_v45  ;;  %v1944_v10 = vpack.c.bf16 %v2448_v48, %v2446_v52 }
 0x7bb   : > { %v2452_v2 = vpop.eup %2451  ;;  %2471 = vpow2.f32 %v1801_v23  ;;  %v1817_v58 = vmul.f32 1.442695, %v4284_v57  ;;  %1978 = vmatpush1.bf16.msra.mxu1 %v4286_v13  ;;  %v4287_v29 = vsub.f32 %v4246_v22, %v3540_v41  ;;  %v4288_v6 = vsub.f32 %v4247_v50, %v3540_v41  ;;  %v4293_v13 = vld [vmem:[#allocation21_spill] sm:$0xff] }
 0x7bc   : > { %v2454_v60 = vpop.eup %2453  ;;  %v1885_v55 = vadd.f32 %v3754_v63, %v1884_v11  ;;  %2473 = vpow2.f32 %v1805_v24  ;;  %v1906_v26 = vadd.f32 %v2448_v48, %v1905_v5  ;;  %1979 = vmatprep.subr.bf16.mxu1 %v1944_v10  ;;  %v1946_v52 = vpack.c.bf16 %v2452_v2, %v2450_v43 }
 0x7bd   : > { %v2456_v23 = vpop.eup %2455  ;;  %2475 = vpow2.f32 %v1809_v54  ;;  %v1825_v49 = vmul.f32 1.442695, %v4287_v29  ;;  %v1829_v45 = vmul.f32 1.442695, %v4288_v6  ;;  %v4289_v48 = vsub.f32 %v4248_v62, %v3540_v41 }
 0x7be   : > { %v2458_v27 = vpop.eup %2457  ;;  %v1886_v47 = vadd.f32 %v3762_v59, %v1885_v55  ;;  %2477 = vpow2.f32 %v1813_v42  ;;  %v1907_v12 = vadd.f32 %v2450_v43, %v1906_v26  ;;  %v1948_v11 = vpack.c.bf16 %v2456_v23, %v2454_v60 }
 0x7bf   : > { %v2460_v24 = vpop.eup %2459  ;;  %2479 = vpow2.f32 %v1817_v58  ;;  %v1833_v54 = vmul.f32 1.442695, %v4289_v48  ;;  %v4290_v22 = vsub.f32 %v4249_v28, %v3540_v41  ;;  %v4291_v50 = vpack.c.bf16 %v3648_v25, %v3640_v20 }
 0x7c0   : > { %v2462_v10 = vpop.eup %2461  ;;  %v1887_v57 = vadd.f32 %v3771_v56, %v1886_v47  ;;  %2481 = vpow2.f32 %v1821_v46  ;;  %v1908_v43 = vadd.f32 %v2452_v2, %v1907_v12  ;;  %v1950_v42 = vpack.c.bf16 %v2460_v24, %v2458_v27 }
 0x7c1   : > { %v1837_v5 = vmul.f32 1.442695, %v4290_v22  ;;  %1980 = vmatpush1.bf16.msra.mxu1 %v4291_v50  ;;  %v2464_v58 = vpop.eup %2463  ;;  %2483 = vpow2.f32 %v1825_v49  ;;  %v4292_v62 = vsub.f32 %v4250_v1, %v3540_v41  ;;  %v4294_v28 = vsub.f32 %v4293_v13, %v3540_v41  ;;  %v4296_v49 = vld [vmem:[#allocation4_spill] sm:$0xff] }
 0x7c2   : > { %1981 = vmatprep.subr.bf16.mxu1 %v1946_v52  ;;  %v2466_v26 = vpop.eup %2465  ;;  %v1888_v20 = vadd.f32 %v3782_v18, %v1887_v57  ;;  %2485 = vpow2.f32 %v1829_v45  ;;  %v1909_v25 = vadd.f32 %v2454_v60, %v1908_v43  ;;  %v1952_v29 = vpack.c.bf16 %v2464_v58, %v2462_v10 }
 0x7c3   : > { %v1841_v14 = vmul.f32 1.442695, %v4292_v62  ;;  %v1845_v55 = vmul.f32 1.442695, %v4294_v28  ;;  %v2468_v46 = vpop.eup %2467  ;;  %2487 = vpow2.f32 %v1833_v54  ;;  %v4295_v2 = vsub.f32 %v4252_v37, %v3540_v41 }
 0x7c4   : > { %v4297_v1 = vsub.f32 %v4296_v49, %v3540_v41  ;;  %v4298_v47 = vpack.c.bf16 %v3663_v9, %v3656_v15  ;;  %v2470_v12 = vpop.eup %2469  ;;  %v1889_v48 = vadd.f32 %v3791_v19, %v1888_v20  ;;  %2489 = vpow2.f32 %v1837_v5 }
 0x7c5   : > { %v1849_v52 = vmul.f32 1.442695, %v4295_v2  ;;  %v1910_v60 = vadd.f32 %v2456_v23, %v1909_v25  ;;  %v1954_v45 = vpack.c.bf16 %v2468_v46, %v2466_v26  ;;  %v2472_v54 = vpop.eup %2471  ;;  %2491 = vpow2.f32 %v1841_v14  ;;  %v4301_v23 = vld [vmem:[#allocation26_spill] sm:$0xff] }
 0x7c6   : > { %v1853_v6 = vmul.f32 1.442695, %v4297_v1  ;;  %1982 = vmatpush1.bf16.msra.mxu1 %v4298_v47  ;;  %v4299_v37 = vsub.f32 %v4254_v53, %v3540_v41  ;;  %v4300_v50 = vsub.f32 %v4255_v44, %v3540_v41  ;;  %v2474_v43 = vpop.eup %2473  ;;  %v1890_v9 = vadd.f32 %v3799_v34, %v1889_v48 }
 0x7c7   : > { %1983 = vmatprep.subr.bf16.mxu1 %v1948_v11  ;;  %2493 = vpow2.f32 %v1845_v55  ;;  %v1911_v15 = vadd.f32 %v2458_v27, %v1910_v60  ;;  %v1956_v62 = vpack.c.bf16 %v2472_v54, %v2470_v12  ;;  %v2476_v5 = vpop.eup %2475  ;;  %v4302_v11 = vsub.f32 %v4301_v23, %v3540_v41 }
 0x7c8   : > { %v1857_v22 = vmul.f32 1.442695, %v4299_v37  ;;  %v1861_v57 = vmul.f32 1.442695, %v4300_v50  ;;  %2495 = vpow2.f32 %v1849_v52  ;;  %v4303_v53 = vpack.c.bf16 %v3678_v36, %v3671_v40  ;;  %v2478_v13 = vpop.eup %2477 }
 0x7c9   : > { %v1865_v14 = vmul.f32 1.442695, %v4302_v11  ;;  %v1891_v44 = vadd.f32 %v3806_v30, %v1890_v9  ;;  %2497 = vpow2.f32 %v1853_v6  ;;  %v1912_v28 = vadd.f32 %v2460_v24, %v1911_v15  ;;  %v2480_v55 = vpop.eup %2479 }
 0x7ca   : > { %1984 = vmatpush1.bf16.msra.mxu1 %v4303_v53  ;;  %v1958_v20 = vpack.c.bf16 %v2476_v5, %v2474_v43  ;;  %2499 = vpow2.f32 %v1857_v22  ;;  %v2482_v27 = vpop.eup %2481  ;;  %v1960_v41 = vpack.c.bf16 %v2480_v55, %v2478_v13  ;;  %v4304_v36 = vpack.c.bf16 %v3693_v38, %v3686_v39 }
 0x7cb   : > { %1985 = vmatprep.subr.bf16.mxu1 %v1950_v42  ;;  %v1892_v25 = vadd.f32 %v3814_v35, %v1891_v44  ;;  %2501 = vpow2.f32 %v1861_v57  ;;  %v1913_v2 = vadd.f32 %v2462_v10, %v1912_v28  ;;  %v2484_v52 = vpop.eup %2483  ;;  %v4305_v37 = vpack.c.bf16 %v3707_v0, %v3701_v3 }
 0x7cc   : > { %2503 = vpow2.f32 %v1865_v14  ;;  %v2486_v40 = vpop.eup %2485  ;;  %v1962_v42 = vpack.c.bf16 %v2484_v52, %v2482_v27  ;;  %v4307_v44 = vpack.c.bf16 %v3732_v31, %v3726_v17  ;;  %v4311_v17 = vpack.c.bf16 %v3771_v56, %v3762_v59 }
 0x7cd   : > { %v1893_v49 = vadd.f32 %v3821_v33, %v1892_v25  ;;  %v1914_v24 = vadd.f32 %v2464_v58, %v1913_v2  ;;  %v2488_v1 = vpop.eup %2487  ;;  %v4308_v25 = vld [vmem:[#allocation8_spill] sm:$0xff]  ;;  %v4314_v59 = vpack.c.bf16 %v3821_v33, %v3814_v35 }
 0x7ce   : > { %1986 = vmatpush1.bf16.msra.mxu1 %v4304_v36  ;;  %v2490_v6 = vpop.eup %2489  ;;  %v1964_v60 = vpack.c.bf16 %v2488_v1, %v2486_v40 }
 0x7cf   : > { %1987 = vmatprep.subr.bf16.mxu1 %v1952_v29  ;;  %v1894_v47 = vadd.f32 %v3829_v51, %v1893_v49  ;;  %v1915_v48 = vadd.f32 %v2466_v26, %v1914_v24  ;;  %v2492_v10 = vpop.eup %2491  ;;  %v4306_v26 = vpack.c.bf16 %v3720_v16, %v3713_v32  ;;  %v4309_v32 = vpack.c.bf16 %v3743_v8, %v4308_v25 }
 0x7d0   : > { %v1966_v50 = vpack.c.bf16 %v2492_v10, %v2490_v6  ;;  %v4312_v8 = vpack.c.bf16 %v3791_v19, %v3782_v18  ;;  %v4315_v18 = vpack.c.bf16 %v3837_v61, %v3829_v51 }
 0x7d1   : > { %v2494_v22 = vpop.eup %2493  ;;  %v1895_v38 = vadd.f32 %v3837_v61, %v1894_v47  ;;  %v1916_v39 = vadd.f32 %v2468_v46, %v1915_v48 }
 0x7d2   : > { %1988 = vmatpush1.bf16.msra.mxu1 %v4305_v37  ;;  %v2496_v58 = vpop.eup %2495 }
 0x7d3   : > { %1989 = vmatprep.subr.bf16.mxu1 %v1954_v45  ;;  %v2498_v29 = vpop.eup %2497  ;;  %v1896_v57 = vadd.f32 %v3842_v21, %v1895_v38  ;;  %v1917_v9 = vadd.f32 %v2470_v12, %v1916_v39  ;;  %v1968_v15 = vpack.c.bf16 %v2496_v58, %v2494_v22  ;;  %v2022_v39 = vld [vmem:[%s4004_s7] sm:$0xf] }
 0x7d4   : > { %v2500_v23 = vpop.eup %2499 }
 0x7d5   : > { %v2502_v11 = vpop.eup %2501  ;;  %v1897_v0 = vadd.f32 %v3850_v4, %v1896_v57  ;;  %v1918_v3 = vadd.f32 %v2472_v54, %v1917_v9  ;;  %v1970_v14 = vpack.c.bf16 %v2500_v23, %v2498_v29  ;;  %v4310_v54 = vpack.c.bf16 %v3754_v63, %v3748_v7 }
 0x7d6   : > { %1990 = vmatpush1.bf16.msra.mxu1 %v4306_v26  ;;  %v2504_v46 = vpop.eup %2503  ;;  %v4313_v7 = vpack.c.bf16 %v3806_v30, %v3799_v34  ;;  %v4316_v34 = vpack.c.bf16 %v3850_v4, %v3842_v21  ;;  %v4317_v30 = vld [vmem:[#allocation7_spill] sm:$0xff] }
 0x7d7   : > { %1991 = vmatprep.subr.bf16.mxu1 %v1956_v62  ;;  %v1919_v45 = vadd.f32 %v2474_v43, %v1918_v3  ;;  %v1972_v53 = vpack.c.bf16 %v2504_v46, %v2502_v11  ;;  %v1898_v33 = vrot.slane %v1897_v0, 4 }
 0x7d9   : > { %v1920_v12 = vadd.f32 %v2476_v5, %v1919_v45  ;;  %v1899_v36 = vadd.f32 %v1898_v33, %v1897_v0  ;;  %v4323_v45 = vld [vmem:[#allocation2_spill] sm:$0xff] }
 0x7da   : > { %1992 = vmatpush1.bf16.msra.mxu1 %v4307_v44 }
 0x7db   : > { %1993 = vmatprep.subr.bf16.mxu1 %v1958_v20  ;;  %v1921_v28 = vadd.f32 %v2478_v13, %v1920_v12  ;;  %v1900_v49 = vrot.slane %v1899_v36, 2 }
 0x7dd   : > { %v1922_v16 = vadd.f32 %v2480_v55, %v1921_v28 }
 0x7de   : > { %1994 = vmatpush1.bf16.msra.mxu1 %v4309_v32 }
 0x7df   : > { %1995 = vmatprep.subr.bf16.mxu1 %v1960_v41  ;;  %v1923_v2 = vadd.f32 %v2482_v27, %v1922_v16  ;;  %v1973_v41 = vrot.slane %v4317_v30, 2 }
 0x7e1   : > { %v1924_v43 = vadd.f32 %v2484_v52, %v1923_v2  ;;  %v4318_v52 = vmov 0.0  }
 0x7e2   : > { %1996 = vmatpush1.bf16.msra.mxu1 %v4310_v54 }
 0x7e3   : > { %1997 = vmatprep.subr.bf16.mxu1 %v1962_v42  ;;  %v1925_v62 = vadd.f32 %v2486_v40, %v1924_v43  ;;  %v1901_v42 = vadd.f32 %v1900_v49, %v1899_v36 }
 0x7e5   : > { %v1926_v31 = vadd.f32 %v2488_v1, %v1925_v62  ;;  %v1902_v51 = vrot.slane %v1901_v42, 1 }
 0x7e6   : > { %1998 = vmatpush1.bf16.msra.mxu1 %v4311_v17 }
 0x7e7   : > { %1999 = vmatprep.subr.bf16.mxu1 %v1964_v60  ;;  %v1927_v5 = vadd.f32 %v2490_v6, %v1926_v31  ;;  %v1903_v6 = vadd.f32 %v1902_v51, %v1901_v42 }
 0x7e9   : > { %v1928_v13 = vadd.f32 %v2492_v10, %v1927_v5  ;;  %2505 = vrcp.f32 %v1903_v6 }
 0x7ea   : > { %2000 = vmatpush1.bf16.msra.mxu1 %v4312_v8 }
 0x7eb   : > { %2001 = vmatprep.subr.bf16.mxu1 %v1966_v50  ;;  %v1929_v20 = vadd.f32 %v2494_v22, %v1928_v13  ;;  %v2027_v50 = vpop.permute.xlu1 %2026 }
 0x7ed   : > { %v1930_v63 = vadd.f32 %v2496_v58, %v1929_v20 }
 0x7ee   : > { %2002 = vmatpush1.bf16.msra.mxu1 %v4313_v7 }
 0x7ef   : > { %2003 = vmatprep.subr.bf16.mxu1 %v1968_v15  ;;  %v1931_v55 = vadd.f32 %v2498_v29, %v1930_v63  ;;  %v4319_v15 = vld [vmem:[#allocation5_spill] sm:$0xff] }
 0x7f1   : > { %v1932_v56 = vadd.f32 %v2500_v23, %v1931_v55  ;;  %v4320_v23 = vmax.f32 %v4319_v15, 0.0 }
 0x7f2   : > { %2004 = vmatpush1.bf16.msra.mxu1 %v4314_v59 }
 0x7f3   : > { %2005 = vmatprep.subr.bf16.mxu1 %v1970_v14  ;;  %v1933_v27 = vadd.f32 %v2502_v11, %v1932_v56  ;;  %v2506_v21 = vpop.eup %2505  ;;  %v4321_v11 = vld [vmem:[#allocation6_spill] sm:$0xff] }
 0x7f4   : > { %v4322_v0 = vmax.f32 %v4321_v11, 0.0  ;;  %v2510_v14 = vld [vmem:[%s2592_s16] sm:$0xff] }
 0x7f5   : > { %v1934_v19 = vadd.f32 %v2504_v46, %v1933_v27 }
 0x7f6   : > { %2006 = vmatpush1.bf16.msra.mxu1 %v4315_v18 }
 0x7f7   : > { %2007 = vmatprep.subr.bf16.mxu1 %v1972_v53  ;;  %v1935_v35 = vrot.slane %v1934_v19, 4 }
 0x7f9   : > { %v1936_v40 = vadd.f32 %v1935_v35, %v1934_v19 }
 0x7fa   : > { %2008 = vmatpush1.bf16.msra.mxu1 %v4316_v34 }
 0x7fb   : > { %v1937_v24 = vrot.slane %v1936_v40, 2 }
 0x7fd   : > { %2010 = vmatmul.mubr.bf16.vlgmr.msra.gmra.mrb[68].mxu1 %v1973_v41  ;;  %v1938_v61 = vadd.f32 %v1937_v24, %v1936_v40 }
 0x7fe   : > { %2102 = vmatprep.mubr.f32.mxu1 %v4318_v52 }
 0x7ff   : > { %v1939_v1 = vrot.slane %v1938_v61, 1 }
 0x801   : > { %v1940_v47 = vadd.f32 %v1939_v1, %v1938_v61 }
 0x803   : > { %2507 = vrcp.f32 %v1940_v47 }
 0x80d   : > { %v2508_v48 = vpop.eup %2507 }
 0x8d0   : > { %v2011_v4 = vpop.f32.mrb[68].mxu1 }
 0x8d1   : > { %v2020_v60 = vmul.f32 %v2506_v21, %v2011_v4  ;;  %v2013_v10 = vpop.f32.mrb[69].mxu1 }
 0x8d2   : > { %v2021_v37 = vmul.f32 %v2508_v48, %v2013_v10  ;;  %v2015_v22 = vpop.f32.mrb[70].mxu1 }
 0x8d3   : > { %v2016_v38 = vpop.f32.mrb[71].mxu1 }
 0x8d4   : > { %2225 = vmatprep.subr.msk.mxu1 %vm1144_vm4, %v2021_v37 }
 0x8d5   : > { %2226 = vmatpush1.msk.msra.mxu1 %vm1144_vm4, %v2020_v60 }
 0x8d6   : > { %2227 = vmatmul.mubr.msk.f32.vlgmr.msra.gmra.mrb[2].mxu1 %vm464_vm3, %v2022_v39 }
 0x9a9   : > { %v2104_v58 = vpop.f32.mrb[2].mxu1 }
 0x9aa   : > { %v2105_v29 = vadd.f32 %v2104_v58, %v2027_v50  ;;  %v2106_v57 = vpop.f32.mrb[3].mxu1 }
 0x9ab   : > { %v2107_v9 = vadd.f32 %v2106_v57, %v2027_v50 }
 0x9ac   : > { %v2109_v26 = vadd.f32 %v2105_v29, %v4320_v23 }
 0x9ad   : > { %v2110_v3 = vadd.f32 %v2107_v9, %v4322_v0 }
 0x9ae   : > { %v2111_v46 = vadd.f32 %v2510_v14, %v2109_v26 }
 0x9af   : > { %v2112_v53 = vadd.f32 %v2110_v3, %v4323_v45 }
 0x9b1   : > { %v2115_v44 = vcombine.low %v2111_v46, %v2112_v53 }
 0x9b3   : > { %2117 = vst [vmem:[%s332_s15] sm:$0xff] %v2115_v44 }
 0x9b4 PF: > { %s19_s30 = sadd.s32 1, %s2517_s30  }
 0x9b5   : > { %p16_p4 = scmp.ge.s32.totalorder %s19_s30, 4  }
 0x9b7   :  { %18 = sbr.rel (!%p16_p4) target bundleno = 1 (0x1), region = 86 }

</bundles_post_ra>
